<compile_context>
chip_gen: v5e
topology: v5e:2x2
jax: 0.10.0
libtpu: 0.0.40
codegen_flags: <defaults>
</compile_context>

<pallas_src>
import math

import jax
import jax.numpy as jnp
from jax.experimental import pallas as pl
from jax.experimental.pallas import tpu as pltpu


# ---------------------------------------------------------------------------
# Shared math helpers (used inside the Pallas kernel AND in the JAX reference,
# so the kernel/reference math is identical).
# ---------------------------------------------------------------------------
def _layernorm(x, gamma, beta, eps=1e-12):
    # single pass: var = E[x^2] - mean^2 (one fewer cross-lane reduction)
    mean = jnp.mean(x, axis=-1, keepdims=True)
    msq = jnp.mean(x * x, axis=-1, keepdims=True)
    var = msq - mean * mean
    return (x - mean) * jax.lax.rsqrt(var + eps) * gamma + beta


def _gelu(x):
    # tanh-approximate GELU (EUP tanh, cheap on TPU)
    return 0.5 * x * (1.0 + jnp.tanh(0.7978845608028654 * (x + 0.044715 * x * x * x)))


def _round_up(n, m):
    return ((n + m - 1) // m) * m


# ---------------------------------------------------------------------------
# Single fused Pallas kernel: all encoder layers + classifier heads
#   grid = (batch_tiles, num_layers)  -> ("parallel", "arbitrary")
# ---------------------------------------------------------------------------
def fused_encoder_heads_kernel(x_hbm_ref, mask_ref,
                               wqkv_ref, wo_ref, w1_ref, w2_ref, pk_ref,
                               wh_ref, bh_ref,
                               cls_ref, logits_ref,
                               act_ref, dma_sem):
    i = pl.program_id(0)            # batch tile (parallel -> both TCs on v7x)
    l = pl.program_id(1)            # encoder layer (sequential sweep)
    n_layers = pl.num_programs(1)

    BT, S, H = act_ref.shape
    F = w1_ref.shape[-1]

    # First layer step for this batch tile: DMA the embedding slice straight
    # from HBM into the resident activation (embedding is memory_space=pl.ANY,
    # so it never occupies a pipelined VMEM buffer across the layer sweep).
    @pl.when(l == 0)
    def _():
        cp = pltpu.make_async_copy(x_hbm_ref.at[pl.ds(i * BT, BT)], act_ref, dma_sem)
        cp.start()
        cp.wait()

    x3 = act_ref[...]                               # (BT, S, H) f32
    x2 = x3.reshape(BT * S, H)                      # fold batch into matmul M dim

    # Packed per-layer small params (one DMA):
    #   rows = [bqkv(3H, q-part pre-scaled) | bo | b1 | b2 | ln1g | ln1b | ln2g | ln2b]
    pk = pk_ref[...]                                # (8, PW) f32
    bqkv = pk[0:1, : 3 * H]
    bo = pk[1:2, :H]
    b1 = pk[2:3, :F]
    b2 = pk[3:4, :H]
    ln1g, ln1b = pk[4:5, :H], pk[5:6, :H]
    ln2g, ln2b = pk[6:7, :H], pk[7:8, :H]

    # --- self attention (single head), fused QKV projection -----------------
    # Weights stream from HBM as bf16; compute in f32 (v5e VPU/EUP have no bf16).
    qkv = jnp.dot(x2, wqkv_ref[...].astype(jnp.float32),
                  preferred_element_type=jnp.float32) + bqkv
    qkv = qkv.reshape(BT, S, 3 * H)
    q = qkv[..., :H]                 # 1/sqrt(H) already folded into Wq / bq
    k = qkv[..., H:2 * H]            # H is a 128-multiple -> lane-aligned splits
    v = qkv[..., 2 * H:]

    scores = jnp.einsum("bqd,bkd->bqk", q, k,
                        preferred_element_type=jnp.float32)       # (BT,S,S)
    scores = scores + mask_ref[...]      # precomputed additive mask (BT,1,S), f32

    scores = scores - jnp.max(scores, axis=-1, keepdims=True)
    p = jnp.exp(scores)
    # Approximate reciprocal goes to the otherwise-idle EUP slot.
    p = p * pl.reciprocal(jnp.sum(p, axis=-1, keepdims=True), approx=True)

    ctx = jnp.einsum("bqk,bkd->bqd", p, v,
                     preferred_element_type=jnp.float32)          # (BT,S,H)
    attn = jnp.dot(ctx.reshape(BT * S, H), wo_ref[...].astype(jnp.float32),
                   preferred_element_type=jnp.float32) + bo

    h = _layernorm(x2 + attn, ln1g, ln1b)                         # (BT*S, H)

    # --- feed forward --------------------------------------------------------
    # TODO(synk): at real BERT-base dims, tile this over the F dimension
    # (512-wide W1-column / W2-row chunks + f32 VMEM accumulator) so per-layer
    # weights and the (rows,F) GELU intermediate fit v7x's 64 MiB VMEM.
    ff = _gelu(jnp.dot(h, w1_ref[...].astype(jnp.float32),
                       preferred_element_type=jnp.float32) + b1)
    ff = jnp.dot(ff, w2_ref[...].astype(jnp.float32),
                 preferred_element_type=jnp.float32) + b2
    y = _layernorm(h + ff, ln2g, ln2b)                            # (BT*S, H)

    y3 = y.reshape(BT, S, H)
    act_ref[...] = y3

    # Last layer step: CLS row -> all classifier heads in one fused matmul,
    # computed from the LIVE value y3 (no act_ref re-load).
    @pl.when(l == n_layers - 1)
    def _():
        cls = y3[:, 0, :]                                         # (BT, H)
        cls_ref[...] = y3[:, 0:1, :]                              # (BT, 1, H)
        logits = (jnp.dot(cls, wh_ref[...].astype(jnp.float32),
                          preferred_element_type=jnp.float32)
                  + bh_ref[...])                                  # (BT, Tpad)
        logits_ref[...] = logits.reshape(BT, 1, logits.shape[-1])


def run_model(x_emb, addmask, stacks, w_cat, b_cat):
    """x_emb: (B,S,H) f32 embeddings; addmask: (B,1,S) f32 additive mask.
    Returns cls (B,1,H) and lane-padded fused head logits (B,1,Tpad)."""
    B, S, H = x_emb.shape
    L = stacks["wqkv"].shape[0]
    F = stacks["w1"].shape[-1]
    PW = stacks["packed"].shape[-1]
    T = w_cat.shape[-1]

    # Two batch tiles -> the "parallel" axis feeds both TensorCores on v7x.
    n_bt = 2 if (B >= 2 and B % 2 == 0) else 1
    BT = B // n_bt

    def layer_spec(shape):
        # per-layer weight block: leading layer dim squeezed, indexed by grid step
        return pl.BlockSpec((None,) + shape, lambda i, l: (l,) + (0,) * len(shape))

    def batch_spec(shape):
        # per-batch-tile block, constant across the layer axis
        return pl.BlockSpec((BT,) + shape, lambda i, l: (i,) + (0,) * len(shape))

    def fixed_spec(shape):
        # constant block across the whole grid
        return pl.BlockSpec(shape, lambda i, l: (0,) * len(shape))

    # Explicit scoped-VMEM budget sized from the actual buffers (defaults are
    # 16 MiB on v5e / 32 MiB on v6e & v7x and get exceeded at non-toy sizes).
    per_layer_bytes = sum(
        int(math.prod(stacks[k].shape[1:])) * stacks[k].dtype.itemsize
        for k in ("wqkv", "wo", "w1", "w2", "packed"))
    fixed_bytes = (w_cat.size * w_cat.dtype.itemsize
                   + b_cat.size * b_cat.dtype.itemsize
                   + addmask.size * 4
                   + BT * S * H * 4          # resident activation scratch
                   + B * H * 4 + B * T * 4)  # outputs
    vmem_limit = int(min(max(4 * per_layer_bytes + 2 * fixed_bytes + (8 << 20),
                             32 << 20),
                         56 << 20))          # stay under v7x's 64 MiB ceiling

    return pl.pallas_call(
        fused_encoder_heads_kernel,
        out_shape=(jax.ShapeDtypeStruct((B, 1, H), jnp.float32),   # cls_hs
                   jax.ShapeDtypeStruct((B, 1, T), jnp.float32)),  # fused logits
        grid=(n_bt, L),
        in_specs=[
            pl.BlockSpec(memory_space=pl.ANY),   # embeddings stay in HBM
            batch_spec((1, S)),                  # additive attention mask (f32)
            layer_spec((H, 3 * H)),              # fused Wqkv (bf16)
            layer_spec((H, H)),                  # Wo        (bf16)
            layer_spec((H, F)),                  # W1        (bf16)
            layer_spec((F, H)),                  # W2        (bf16)
            layer_spec((8, PW)),                 # packed biases / LayerNorm (f32)
            fixed_spec((H, T)),                  # concat head weights (bf16, padded)
            fixed_spec((1, T)),                  # concat head biases  (f32, padded)
        ],
        out_specs=[batch_spec((1, H)), batch_spec((1, T))],
        scratch_shapes=[pltpu.VMEM((BT, S, H), jnp.float32),   # resident activation
                        pltpu.SemaphoreType.DMA(())],          # embedding-copy sem
        compiler_params=pltpu.CompilerParams(
            dimension_semantics=("parallel", "arbitrary"),
            vmem_limit_bytes=vmem_limit),
    )(x_emb, addmask, stacks["wqkv"], stacks["wo"], stacks["w1"],
      stacks["w2"], stacks["packed"], w_cat, b_cat)


# ---------------------------------------------------------------------------
# BaseCIL-equivalent module (feature extractor + incremental heads)
# ---------------------------------------------------------------------------
class BaseCILPallas:
    def __init__(self, *, vocab_size=100, max_seq=16, hidden=128, ffn=256,
                 num_layers=2, seed=0):
        self.fe_out_size = hidden
        self.ffn = ffn
        self.max_seq = max_seq
        key = jax.random.PRNGKey(seed)

        def nrm(k, shape, scale=0.02):
            return (scale * jax.random.normal(k, shape)).astype(jnp.float32)

        k_emb, k_pos, key = jax.random.split(key, 3)
        self.word_emb = nrm(k_emb, (vocab_size, hidden))
        self.pos_emb = nrm(k_pos, (max_seq, hidden))

        scale = 1.0 / math.sqrt(hidden)
        PW = max(3 * hidden, ffn)

        def pad_row(row):
            return jnp.pad(row, ((0, 0), (0, PW - row.shape[-1])))

        wqkv_l, wo_l, w1_l, w2_l, pk_l = [], [], [], [], []
        for _ in range(num_layers):
            ks = jax.random.split(key, 7)
            key = ks[0]
            wq = nrm(ks[1], (hidden, hidden))
            wk = nrm(ks[2], (hidden, hidden))
            wv = nrm(ks[3], (hidden, hidden))
            wo = nrm(ks[4], (hidden, hidden))
            w1 = nrm(ks[5], (hidden, ffn))
            w2 = nrm(ks[6], (ffn, hidden))
            bq = jnp.zeros((1, hidden), jnp.float32)
            bk = jnp.zeros((1, hidden), jnp.float32)
            bv = jnp.zeros((1, hidden), jnp.float32)
            bo = jnp.zeros((1, hidden), jnp.float32)
            b1 = jnp.zeros((1, ffn), jnp.float32)
            b2 = jnp.zeros((1, hidden), jnp.float32)
            ln1g = jnp.ones((1, hidden), jnp.float32)
            ln1b = jnp.zeros((1, hidden), jnp.float32)
            ln2g = jnp.ones((1, hidden), jnp.float32)
            ln2b = jnp.zeros((1, hidden), jnp.float32)

            # 1/sqrt(H) attention scale folded into the Q third of Wqkv (and bq)
            # at stack-build time, BEFORE the bf16 cast.
            wqkv_l.append(jnp.concatenate([wq * scale, wk, wv], axis=-1))
            wo_l.append(wo)
            w1_l.append(w1)
            w2_l.append(w2)
            pk_l.append(jnp.concatenate([
                pad_row(jnp.concatenate([bq * scale, bk, bv], axis=-1)),
                pad_row(bo), pad_row(b1), pad_row(b2),
                pad_row(ln1g), pad_row(ln1b), pad_row(ln2g), pad_row(ln2b)],
                axis=0))                                           # (8, PW)

        # Weights stream from HBM in bf16 (halves DMA bytes and the
        # double-buffered per-layer weight VMEM); tiny params stay f32.
        self.stacks = {
            "wqkv": jnp.stack(wqkv_l).astype(jnp.bfloat16),   # (L, H, 3H)
            "wo": jnp.stack(wo_l).astype(jnp.bfloat16),       # (L, H, H)
            "w1": jnp.stack(w1_l).astype(jnp.bfloat16),       # (L, H, F)
            "w2": jnp.stack(w2_l).astype(jnp.bfloat16),       # (L, F, H)
            "packed": jnp.stack(pk_l),                        # (L, 8, PW) f32
        }

        # incremental classifier heads (list of (W, b)) — mirrors nn.ModuleList
        self.heads = []
        self.head_sizes = []
        self.w_cat = None      # cached fused (and 128-padded) head weights
        self.b_cat = None
        self.author_cls = jnp.array([], dtype=jnp.int32)
        self.author_offset = jnp.array([], dtype=jnp.int32)
        self._head_key = jax.random.split(key, 1)[0]

    def add_head(self, num_new_authors):
        self._head_key, kw = jax.random.split(self._head_key)
        bound = 1.0 / math.sqrt(self.fe_out_size)
        w = jax.random.uniform(kw, (self.fe_out_size, num_new_authors),
                               minval=-bound, maxval=bound).astype(jnp.float32)
        b = jnp.zeros((1, num_new_authors), jnp.float32)
        self.heads.append((w, b))
        self.head_sizes = [h[0].shape[-1] for h in self.heads]
        # Fuse heads once per session; pad the output dim to a 128-multiple so
        # the logits store inside the kernel is a lane-dense, unmasked vst.
        T = sum(self.head_sizes)
        T_pad = max(128, _round_up(T, 128))
        w_cat = jnp.concatenate([w_ for (w_, _) in self.heads], axis=-1)
        b_cat = jnp.concatenate([b_ for (_, b_) in self.heads], axis=-1)
        self.w_cat = jnp.pad(w_cat, ((0, 0), (0, T_pad - T))).astype(jnp.bfloat16)
        self.b_cat = jnp.pad(b_cat, ((0, 0), (0, T_pad - T)))
        sizes = jnp.array(self.head_sizes, dtype=jnp.int32)
        self.author_cls = sizes
        self.author_offset = jnp.concatenate(
            [jnp.zeros((1,), jnp.int32), jnp.cumsum(sizes)[:-1]])

    def forward(self, input_ids, attention_mask, return_features=False):
        B, S = input_ids.shape
        # TODO(synk): embedding gather (token-id lookup) stays outside the kernel.
        x = jnp.take(self.word_emb, input_ids, axis=0) + self.pos_emb[:S][None, :, :]
        x = x.astype(jnp.float32)
        # Precomputed additive mask: 0 where attended, -1e9 where padded (f32).
        addmask = ((attention_mask.astype(jnp.float32) - 1.0) * 1e9)[:, None, :]

        if self.heads:
            w_cat, b_cat, sizes = self.w_cat, self.b_cat, self.head_sizes
        else:  # features still computed, just no head outputs
            w_cat = jnp.zeros((self.fe_out_size, 128), jnp.bfloat16)
            b_cat = jnp.zeros((1, 128), jnp.float32)
            sizes = []

        cls3, logits3 = run_model(x, addmask, self.stacks, w_cat, b_cat)
        cls_hs = cls3[:, 0, :]
        fused = logits3[:, 0, :]

        outputs = []
        off = 0
        for n in sizes:
            outputs.append(fused[:, off:off + n])
            off += n

        if return_features:
            return outputs, cls_hs
        return outputs


# ---------------------------------------------------------------------------
# Pure-JAX reference (uses the same bf16-stored weights, exact softmax division)
# ---------------------------------------------------------------------------
def reference_forward(model, input_ids, attention_mask):
    B, S = input_ids.shape
    H, F = model.fe_out_size, model.ffn
    x = jnp.take(model.word_emb, input_ids, axis=0) + model.pos_emb[:S][None, :, :]
    x = x.astype(jnp.float32)
    addmask = ((attention_mask.astype(jnp.float32) - 1.0) * 1e9)[:, None, :]
    L = model.stacks["wqkv"].shape[0]
    for l in range(L):
        wqkv = model.stacks["wqkv"][l].astype(jnp.float32)
        wo = model.stacks["wo"][l].astype(jnp.float32)
        w1 = model.stacks["w1"][l].astype(jnp.float32)
        w2 = model.stacks["w2"][l].astype(jnp.float32)
        pk = model.stacks["packed"][l]
        bqkv, bo = pk[0:1, :3 * H], pk[1:2, :H]
        b1, b2 = pk[2:3, :F], pk[3:4, :H]
        ln1g, ln1b = pk[4:5, :H], pk[5:6, :H]
        ln2g, ln2b = pk[6:7, :H], pk[7:8, :H]

        qkv = x @ wqkv + bqkv
        q, k, v = qkv[..., :H], qkv[..., H:2 * H], qkv[..., 2 * H:]
        s = jnp.einsum("bqd,bkd->bqk", q, k) + addmask     # Wq already pre-scaled
        p = jax.nn.softmax(s, axis=-1)
        attn = jnp.einsum("bqk,bkd->bqd", p, v) @ wo + bo
        h = _layernorm(x + attn, ln1g, ln1b)
        ff = _gelu(h @ w1 + b1)
        x = _layernorm(h + ff @ w2 + b2, ln2g, ln2b)
    cls = x[:, 0, :]
    outs = [cls @ (w.astype(jnp.bfloat16).astype(jnp.float32)) + b
            for (w, b) in model.heads]
    return outs, cls


# ---------------------------------------------------------------------------
if __name__ == "__main__":
    B, S = 2, 16
    VOCAB = 100

    # H=128 / F=256 keep the demo small but hardware-tile aligned (lane-aligned
    # qkv splits, S a multiple of 8), per the performance review.
    model = BaseCILPallas(vocab_size=VOCAB, max_seq=16, hidden=128, ffn=256,
                          num_layers=2, seed=0)
    model.add_head(3)   # session 1: 3 new authors
    model.add_head(5)   # session 2: 5 new authors

    key = jax.random.PRNGKey(0)
    k_ids, _ = jax.random.split(key)
    input_ids = jax.random.randint(k_ids, (B, S), 0, VOCAB, dtype=jnp.int32)
    attention_mask = jnp.ones((B, S), dtype=jnp.int32).at[1, 12:].set(0)  # pad tail

    outputs, cls_hs = model.forward(input_ids, attention_mask, return_features=True)
    outputs = [jax.block_until_ready(o) for o in outputs]
    cls_hs = jax.block_until_ready(cls_hs)

    ref_outputs, ref_cls = reference_forward(model, input_ids, attention_mask)
    # Tolerance 2e-3: pl.reciprocal(approx=True) in the softmax denominator plus
    # Mosaic-vs-XLA f32 matmul pass differences vs the exact-division reference.
    TOL = 2e-3
    assert cls_hs.shape == ref_cls.shape
    err = float(jnp.max(jnp.abs(cls_hs - ref_cls)))
    assert err < TOL, err
    for o, r in zip(outputs, ref_outputs):
        assert o.shape == r.shape
        err = float(jnp.max(jnp.abs(o - r)))
        assert err < TOL, err

    print("KERNEL_OK")
</pallas_src>

<mosaic_0001>
module attributes {stable_mosaic.version = 11 : i64} {
  func.func @fused_encoder_heads_kernel(%arg0: i32, %arg1: i32, %arg2: memref<2x16x128xf32, #tpu.memory_space<any>>, %arg3: memref<1x1x16xf32, #tpu.memory_space<vmem>>, %arg4: memref<1x128x384xbf16, #tpu.memory_space<vmem>>, %arg5: memref<1x128x128xbf16, #tpu.memory_space<vmem>>, %arg6: memref<1x128x256xbf16, #tpu.memory_space<vmem>>, %arg7: memref<1x256x128xbf16, #tpu.memory_space<vmem>>, %arg8: memref<1x8x384xf32, #tpu.memory_space<vmem>>, %arg9: memref<128x128xbf16, #tpu.memory_space<vmem>>, %arg10: memref<1x128xf32, #tpu.memory_space<vmem>>, %arg11: memref<1x1x128xf32, #tpu.memory_space<vmem>>, %arg12: memref<1x1x128xf32, #tpu.memory_space<vmem>>, %arg13: memref<1x16x128xf32, #tpu.memory_space<vmem>>, %arg14: memref<!tpu.dma_semaphore, #tpu.memory_space<semaphore_mem>>) attributes {dimension_semantics = [#tpu.dimension_semantics<parallel>, #tpu.dimension_semantics<arbitrary>], iteration_bounds = array<i64: 2, 2>, scalar_prefetch = 0 : i64, scratch_operands = 2 : i64, tpu.core_type = #tpu.core_type<tc>, window_params = [{}, {transform_indices = @transform_1, window_bounds = array<i64: 1, 1, 16>}, {transform_indices = @transform_2, window_bounds = array<i64: 1, 128, 384>}, {transform_indices = @transform_3, window_bounds = array<i64: 1, 128, 128>}, {transform_indices = @transform_4, window_bounds = array<i64: 1, 128, 256>}, {transform_indices = @transform_5, window_bounds = array<i64: 1, 256, 128>}, {transform_indices = @transform_6, window_bounds = array<i64: 1, 8, 384>}, {pipeline_mode = #tpu.pipeline_mode<synchronous>, transform_indices = @transform_7, window_bounds = array<i64: 128, 128>}, {pipeline_mode = #tpu.pipeline_mode<synchronous>, transform_indices = @transform_8, window_bounds = array<i64: 1, 128>}, {transform_indices = @transform_9, window_bounds = array<i64: 1, 1, 128>}, {transform_indices = @transform_10, window_bounds = array<i64: 1, 1, 128>}]} {
    %c0_i32 = arith.constant 0 : i32
    %0 = arith.cmpi eq, %arg1, %c0_i32 : i32
    %1 = arith.extui %0 : i1 to i32
    %c0_i32_0 = arith.constant 0 : i32
    %2 = arith.cmpi ne, %1, %c0_i32_0 : i32
    scf.if %2 {
      %c1_i32_46 = arith.constant 1 : i32
      %123 = arith.muli %arg0, %c1_i32_46 : i32
      %c0_i32_47 = arith.constant 0 : i32
      %c0_i32_48 = arith.constant 0 : i32
      %124 = tpu.memref_slice %arg2[%123, %c0_i32_47, %c0_i32_48] : memref<2x16x128xf32, #tpu.memory_space<any>> -> memref<1x16x128xf32, #tpu.memory_space<any>>
      tpu.enqueue_dma source(%124 : memref<1x16x128xf32, #tpu.memory_space<any>>) target(%arg13 : memref<1x16x128xf32, #tpu.memory_space<vmem>>) target_semaphore(%arg14 : memref<!tpu.dma_semaphore, #tpu.memory_space<semaphore_mem>>)
      %c0_i32_49 = arith.constant 0 : i32
      %c0_i32_50 = arith.constant 0 : i32
      %125 = tpu.memref_slice %arg2[%123, %c0_i32_49, %c0_i32_50] : memref<2x16x128xf32, #tpu.memory_space<any>> -> memref<1x16x128xf32, #tpu.memory_space<any>>
      tpu.wait_dma2 semaphore(%arg14 : memref<!tpu.dma_semaphore, #tpu.memory_space<semaphore_mem>>) src(%125 : memref<1x16x128xf32, #tpu.memory_space<any>>) dst(%arg13 : memref<1x16x128xf32, #tpu.memory_space<vmem>>)
    } else {
    }
    %c0 = arith.constant 0 : index
    %c0_1 = arith.constant 0 : index
    %c0_2 = arith.constant 0 : index
    %3 = vector.load %arg13[%c0, %c0_1, %c0_2] : memref<1x16x128xf32, #tpu.memory_space<vmem>>, vector<1x16x128xf32>
    %4 = vector.shape_cast %3 : vector<1x16x128xf32> to vector<16x128xf32>
    %c0_3 = arith.constant 0 : index
    %c0_4 = arith.constant 0 : index
    %c0_5 = arith.constant 0 : index
    %5 = vector.load %arg8[%c0_3, %c0_4, %c0_5] : memref<1x8x384xf32, #tpu.memory_space<vmem>>, vector<1x8x384xf32>
    %6 = vector.shape_cast %5 : vector<1x8x384xf32> to vector<8x384xf32>
    %7 = vector.extract_strided_slice %6 {offsets = [0, 0], sizes = [1, 384], strides = [1, 1]} : vector<8x384xf32> to vector<1x384xf32>
    %8 = vector.extract_strided_slice %6 {offsets = [1, 0], sizes = [1, 128], strides = [1, 1]} : vector<8x384xf32> to vector<1x128xf32>
    %9 = vector.extract_strided_slice %6 {offsets = [2, 0], sizes = [1, 256], strides = [1, 1]} : vector<8x384xf32> to vector<1x256xf32>
    %10 = vector.extract_strided_slice %6 {offsets = [3, 0], sizes = [1, 128], strides = [1, 1]} : vector<8x384xf32> to vector<1x128xf32>
    %11 = vector.extract_strided_slice %6 {offsets = [4, 0], sizes = [1, 128], strides = [1, 1]} : vector<8x384xf32> to vector<1x128xf32>
    %12 = vector.extract_strided_slice %6 {offsets = [5, 0], sizes = [1, 128], strides = [1, 1]} : vector<8x384xf32> to vector<1x128xf32>
    %13 = vector.extract_strided_slice %6 {offsets = [6, 0], sizes = [1, 128], strides = [1, 1]} : vector<8x384xf32> to vector<1x128xf32>
    %14 = vector.extract_strided_slice %6 {offsets = [7, 0], sizes = [1, 128], strides = [1, 1]} : vector<8x384xf32> to vector<1x128xf32>
    %c0_6 = arith.constant 0 : index
    %c0_7 = arith.constant 0 : index
    %c0_8 = arith.constant 0 : index
    %15 = vector.load %arg4[%c0_6, %c0_7, %c0_8] : memref<1x128x384xbf16, #tpu.memory_space<vmem>>, vector<1x128x384xbf16>
    %16 = vector.shape_cast %15 : vector<1x128x384xbf16> to vector<128x384xbf16>
    %17 = arith.extf %16 : vector<128x384xbf16> to vector<128x384xf32>
    %cst = arith.constant dense<0.000000e+00> : vector<16x384xf32>
    %18 = tpu.matmul %4, %17, %cst {dimension_numbers = #tpu.dot_dimension_numbers<[1], [0], [0], [1], [0, 0, 1, 1], [], []>} : vector<16x128xf32>, vector<128x384xf32>, vector<16x384xf32> -> vector<16x384xf32>
    %19 = vector.broadcast %7 : vector<1x384xf32> to vector<16x384xf32>
    %20 = arith.addf %18, %19 : vector<16x384xf32>
    %21 = vector.shape_cast %20 : vector<16x384xf32> to vector<1x16x384xf32>
    %22 = vector.extract_strided_slice %21 {offsets = [0, 0, 0], sizes = [1, 16, 128], strides = [1, 1, 1]} : vector<1x16x384xf32> to vector<1x16x128xf32>
    %23 = vector.extract_strided_slice %21 {offsets = [0, 0, 128], sizes = [1, 16, 128], strides = [1, 1, 1]} : vector<1x16x384xf32> to vector<1x16x128xf32>
    %24 = vector.extract_strided_slice %21 {offsets = [0, 0, 256], sizes = [1, 16, 128], strides = [1, 1, 1]} : vector<1x16x384xf32> to vector<1x16x128xf32>
    "tpu.trace_start"() <{level = 10 : i32, message = "bqd,bkd->bqk"}> : () -> ()
    %cst_9 = arith.constant dense<0.000000e+00> : vector<1x16x16xf32>
    %25 = tpu.matmul %22, %23, %cst_9 {dimension_numbers = #tpu.dot_dimension_numbers<[2], [2], [1], [1], [0, 0, 0, 1, 1, 1], [0], [0]>} : vector<1x16x128xf32>, vector<1x16x128xf32>, vector<1x16x16xf32> -> vector<1x16x16xf32>
    "tpu.trace_stop"() : () -> ()
    %c0_10 = arith.constant 0 : index
    %c0_11 = arith.constant 0 : index
    %c0_12 = arith.constant 0 : index
    %26 = vector.load %arg3[%c0_10, %c0_11, %c0_12] : memref<1x1x16xf32, #tpu.memory_space<vmem>>, vector<1x1x16xf32>
    %27 = vector.broadcast %26 : vector<1x1x16xf32> to vector<1x16x16xf32>
    %28 = arith.addf %25, %27 : vector<1x16x16xf32>
    %cst_13 = arith.constant dense<0xFF800000> : vector<1x16xf32>
    %29 = vector.multi_reduction <maximumf>, %28, %cst_13 [2] : vector<1x16x16xf32> to vector<1x16xf32>
    %30 = vector.shape_cast %29 : vector<1x16xf32> to vector<1x16x1xf32>
    %31 = vector.broadcast %30 : vector<1x16x1xf32> to vector<1x16x16xf32>
    %32 = arith.subf %28, %31 : vector<1x16x16xf32>
    %33 = math.exp %32 : vector<1x16x16xf32>
    %cst_14 = arith.constant dense<0.000000e+00> : vector<1x16xf32>
    %34 = vector.multi_reduction <add>, %33, %cst_14 [2] : vector<1x16x16xf32> to vector<1x16xf32>
    %35 = vector.shape_cast %34 : vector<1x16xf32> to vector<1x16x1xf32>
    %36 = tpu.reciprocal %35 {approx = true} : vector<1x16x1xf32> -> vector<1x16x1xf32>
    %37 = vector.broadcast %36 : vector<1x16x1xf32> to vector<1x16x16xf32>
    %38 = arith.mulf %33, %37 : vector<1x16x16xf32>
    "tpu.trace_start"() <{level = 10 : i32, message = "bqk,bkd->bqd"}> : () -> ()
    %cst_15 = arith.constant dense<0.000000e+00> : vector<1x16x128xf32>
    %39 = tpu.matmul %38, %24, %cst_15 {dimension_numbers = #tpu.dot_dimension_numbers<[2], [1], [1], [2], [0, 0, 0, 1, 1, 2], [0], [0]>} : vector<1x16x16xf32>, vector<1x16x128xf32>, vector<1x16x128xf32> -> vector<1x16x128xf32>
    "tpu.trace_stop"() : () -> ()
    %40 = vector.shape_cast %39 : vector<1x16x128xf32> to vector<16x128xf32>
    %c0_16 = arith.constant 0 : index
    %c0_17 = arith.constant 0 : index
    %c0_18 = arith.constant 0 : index
    %41 = vector.load %arg5[%c0_16, %c0_17, %c0_18] : memref<1x128x128xbf16, #tpu.memory_space<vmem>>, vector<1x128x128xbf16>
    %42 = vector.shape_cast %41 : vector<1x128x128xbf16> to vector<128x128xbf16>
    %43 = arith.extf %42 : vector<128x128xbf16> to vector<128x128xf32>
    %cst_19 = arith.constant dense<0.000000e+00> : vector<16x128xf32>
    %44 = tpu.matmul %40, %43, %cst_19 {dimension_numbers = #tpu.dot_dimension_numbers<[1], [0], [0], [1], [0, 0, 1, 1], [], []>} : vector<16x128xf32>, vector<128x128xf32>, vector<16x128xf32> -> vector<16x128xf32>
    %45 = vector.broadcast %8 : vector<1x128xf32> to vector<16x128xf32>
    %46 = arith.addf %44, %45 : vector<16x128xf32>
    %47 = arith.addf %4, %46 : vector<16x128xf32>
    %cst_20 = arith.constant dense<0.000000e+00> : vector<16xf32>
    %48 = vector.multi_reduction <add>, %47, %cst_20 [1] : vector<16x128xf32> to vector<16xf32>
    %49 = vector.shape_cast %48 : vector<16xf32> to vector<16x1xf32>
    %cst_21 = arith.constant 1.280000e+02 : f32
    %50 = vector.broadcast %cst_21 : f32 to vector<16x1xf32>
    %51 = arith.divf %49, %50 : vector<16x1xf32>
    %52 = arith.mulf %47, %47 : vector<16x128xf32>
    %cst_22 = arith.constant dense<0.000000e+00> : vector<16xf32>
    %53 = vector.multi_reduction <add>, %52, %cst_22 [1] : vector<16x128xf32> to vector<16xf32>
    %54 = vector.shape_cast %53 : vector<16xf32> to vector<16x1xf32>
    %cst_23 = arith.constant 1.280000e+02 : f32
    %55 = vector.broadcast %cst_23 : f32 to vector<16x1xf32>
    %56 = arith.divf %54, %55 : vector<16x1xf32>
    %57 = arith.mulf %51, %51 : vector<16x1xf32>
    %58 = arith.subf %56, %57 : vector<16x1xf32>
    %59 = vector.broadcast %51 : vector<16x1xf32> to vector<16x128xf32>
    %60 = arith.subf %47, %59 : vector<16x128xf32>
    %cst_24 = arith.constant 9.99999996E-13 : f32
    %61 = vector.broadcast %cst_24 : f32 to vector<16x1xf32>
    %62 = arith.addf %58, %61 : vector<16x1xf32>
    %63 = math.rsqrt %62 : vector<16x1xf32>
    %64 = vector.broadcast %63 : vector<16x1xf32> to vector<16x128xf32>
    %65 = arith.mulf %60, %64 : vector<16x128xf32>
    %66 = vector.broadcast %11 : vector<1x128xf32> to vector<16x128xf32>
    %67 = arith.mulf %65, %66 : vector<16x128xf32>
    %68 = vector.broadcast %12 : vector<1x128xf32> to vector<16x128xf32>
    %69 = arith.addf %67, %68 : vector<16x128xf32>
    %c0_25 = arith.constant 0 : index
    %c0_26 = arith.constant 0 : index
    %c0_27 = arith.constant 0 : index
    %70 = vector.load %arg6[%c0_25, %c0_26, %c0_27] : memref<1x128x256xbf16, #tpu.memory_space<vmem>>, vector<1x128x256xbf16>
    %71 = vector.shape_cast %70 : vector<1x128x256xbf16> to vector<128x256xbf16>
    %72 = arith.extf %71 : vector<128x256xbf16> to vector<128x256xf32>
    %cst_28 = arith.constant dense<0.000000e+00> : vector<16x256xf32>
    %73 = tpu.matmul %69, %72, %cst_28 {dimension_numbers = #tpu.dot_dimension_numbers<[1], [0], [0], [1], [0, 0, 1, 1], [], []>} : vector<16x128xf32>, vector<128x256xf32>, vector<16x256xf32> -> vector<16x256xf32>
    %74 = vector.broadcast %9 : vector<1x256xf32> to vector<16x256xf32>
    %75 = arith.addf %73, %74 : vector<16x256xf32>
    %cst_29 = arith.constant 5.000000e-01 : f32
    %76 = vector.broadcast %cst_29 : f32 to vector<16x256xf32>
    %77 = arith.mulf %76, %75 : vector<16x256xf32>
    %cst_30 = arith.constant 4.471500e-02 : f32
    %78 = vector.broadcast %cst_30 : f32 to vector<16x256xf32>
    %79 = arith.mulf %78, %75 : vector<16x256xf32>
    %80 = arith.mulf %79, %75 : vector<16x256xf32>
    %81 = arith.mulf %80, %75 : vector<16x256xf32>
    %82 = arith.addf %75, %81 : vector<16x256xf32>
    %cst_31 = arith.constant 0.797884583 : f32
    %83 = vector.broadcast %cst_31 : f32 to vector<16x256xf32>
    %84 = arith.mulf %83, %82 : vector<16x256xf32>
    %85 = math.tanh %84 : vector<16x256xf32>
    %cst_32 = arith.constant 1.000000e+00 : f32
    %86 = vector.broadcast %cst_32 : f32 to vector<16x256xf32>
    %87 = arith.addf %86, %85 : vector<16x256xf32>
    %88 = arith.mulf %77, %87 : vector<16x256xf32>
    %c0_33 = arith.constant 0 : index
    %c0_34 = arith.constant 0 : index
    %c0_35 = arith.constant 0 : index
    %89 = vector.load %arg7[%c0_33, %c0_34, %c0_35] : memref<1x256x128xbf16, #tpu.memory_space<vmem>>, vector<1x256x128xbf16>
    %90 = vector.shape_cast %89 : vector<1x256x128xbf16> to vector<256x128xbf16>
    %91 = arith.extf %90 : vector<256x128xbf16> to vector<256x128xf32>
    %cst_36 = arith.constant dense<0.000000e+00> : vector<16x128xf32>
    %92 = tpu.matmul %88, %91, %cst_36 {dimension_numbers = #tpu.dot_dimension_numbers<[1], [0], [0], [1], [0, 0, 1, 1], [], []>} : vector<16x256xf32>, vector<256x128xf32>, vector<16x128xf32> -> vector<16x128xf32>
    %93 = vector.broadcast %10 : vector<1x128xf32> to vector<16x128xf32>
    %94 = arith.addf %92, %93 : vector<16x128xf32>
    %95 = arith.addf %69, %94 : vector<16x128xf32>
    %cst_37 = arith.constant dense<0.000000e+00> : vector<16xf32>
    %96 = vector.multi_reduction <add>, %95, %cst_37 [1] : vector<16x128xf32> to vector<16xf32>
    %97 = vector.shape_cast %96 : vector<16xf32> to vector<16x1xf32>
    %cst_38 = arith.constant 1.280000e+02 : f32
    %98 = vector.broadcast %cst_38 : f32 to vector<16x1xf32>
    %99 = arith.divf %97, %98 : vector<16x1xf32>
    %100 = arith.mulf %95, %95 : vector<16x128xf32>
    %cst_39 = arith.constant dense<0.000000e+00> : vector<16xf32>
    %101 = vector.multi_reduction <add>, %100, %cst_39 [1] : vector<16x128xf32> to vector<16xf32>
    %102 = vector.shape_cast %101 : vector<16xf32> to vector<16x1xf32>
    %cst_40 = arith.constant 1.280000e+02 : f32
    %103 = vector.broadcast %cst_40 : f32 to vector<16x1xf32>
    %104 = arith.divf %102, %103 : vector<16x1xf32>
    %105 = arith.mulf %99, %99 : vector<16x1xf32>
    %106 = arith.subf %104, %105 : vector<16x1xf32>
    %107 = vector.broadcast %99 : vector<16x1xf32> to vector<16x128xf32>
    %108 = arith.subf %95, %107 : vector<16x128xf32>
    %cst_41 = arith.constant 9.99999996E-13 : f32
    %109 = vector.broadcast %cst_41 : f32 to vector<16x1xf32>
    %110 = arith.addf %106, %109 : vector<16x1xf32>
    %111 = math.rsqrt %110 : vector<16x1xf32>
    %112 = vector.broadcast %111 : vector<16x1xf32> to vector<16x128xf32>
    %113 = arith.mulf %108, %112 : vector<16x128xf32>
    %114 = vector.broadcast %13 : vector<1x128xf32> to vector<16x128xf32>
    %115 = arith.mulf %113, %114 : vector<16x128xf32>
    %116 = vector.broadcast %14 : vector<1x128xf32> to vector<16x128xf32>
    %117 = arith.addf %115, %116 : vector<16x128xf32>
    %118 = vector.shape_cast %117 : vector<16x128xf32> to vector<1x16x128xf32>
    %c0_42 = arith.constant 0 : index
    %c0_43 = arith.constant 0 : index
    %c0_44 = arith.constant 0 : index
    %119 = vector.load %arg13[%c0_42, %c0_43, %c0_44] : memref<1x16x128xf32, #tpu.memory_space<vmem>>, vector<1x16x128xf32>
    tpu.vector_store %arg13[%c0_42, %c0_43, %c0_44], %118 {strides = array<i32>} : memref<1x16x128xf32, #tpu.memory_space<vmem>>, vector<1x16x128xf32>,
    %c1_i32 = arith.constant 1 : i32
    %120 = arith.cmpi eq, %arg1, %c1_i32 : i32
    %121 = arith.extui %120 : i1 to i32
    %c0_i32_45 = arith.constant 0 : i32
    %122 = arith.cmpi ne, %121, %c0_i32_45 : i32
    scf.if %122 {
      %123 = vector.extract_strided_slice %118 {offsets = [0, 0, 0], sizes = [1, 1, 128], strides = [1, 1, 1]} : vector<1x16x128xf32> to vector<1x1x128xf32>
      %124 = vector.shape_cast %123 : vector<1x1x128xf32> to vector<1x128xf32>
      %125 = vector.extract_strided_slice %118 {offsets = [0, 0, 0], sizes = [1, 1, 128], strides = [1, 1, 1]} : vector<1x16x128xf32> to vector<1x1x128xf32>
      %c0_46 = arith.constant 0 : index
      %c0_47 = arith.constant 0 : index
      %c0_48 = arith.constant 0 : index
      %126 = vector.load %arg11[%c0_46, %c0_47, %c0_48] : memref<1x1x128xf32, #tpu.memory_space<vmem>>, vector<1x1x128xf32>
      tpu.vector_store %arg11[%c0_46, %c0_47, %c0_48], %125 {strides = array<i32>} : memref<1x1x128xf32, #tpu.memory_space<vmem>>, vector<1x1x128xf32>,
      %c0_49 = arith.constant 0 : index
      %c0_50 = arith.constant 0 : index
      %127 = vector.load %arg9[%c0_49, %c0_50] : memref<128x128xbf16, #tpu.memory_space<vmem>>, vector<128x128xbf16>
      %128 = arith.extf %127 : vector<128x128xbf16> to vector<128x128xf32>
      %cst_51 = arith.constant dense<0.000000e+00> : vector<1x128xf32>
      %129 = tpu.matmul %124, %128, %cst_51 {dimension_numbers = #tpu.dot_dimension_numbers<[1], [0], [0], [1], [0, 0, 1, 1], [], []>} : vector<1x128xf32>, vector<128x128xf32>, vector<1x128xf32> -> vector<1x128xf32>
      %c0_52 = arith.constant 0 : index
      %c0_53 = arith.constant 0 : index
      %130 = vector.load %arg10[%c0_52, %c0_53] : memref<1x128xf32, #tpu.memory_space<vmem>>, vector<1x128xf32>
      %131 = arith.addf %129, %130 : vector<1x128xf32>
      %132 = vector.shape_cast %131 : vector<1x128xf32> to vector<1x1x128xf32>
      %c0_54 = arith.constant 0 : index
      %c0_55 = arith.constant 0 : index
      %c0_56 = arith.constant 0 : index
      %133 = vector.load %arg12[%c0_54, %c0_55, %c0_56] : memref<1x1x128xf32, #tpu.memory_space<vmem>>, vector<1x1x128xf32>
      tpu.vector_store %arg12[%c0_54, %c0_55, %c0_56], %132 {strides = array<i32>} : memref<1x1x128xf32, #tpu.memory_space<vmem>>, vector<1x1x128xf32>,
    } else {
    }
    return
  }
  func.func @transform_1(%arg0: i32, %arg1: i32) -> (i32, i32, i32) {
    %c0_i32 = arith.constant 0 : i32
    %c0_i32_0 = arith.constant 0 : i32
    %c0_i32_1 = arith.constant 0 : i32
    return %arg0, %c0_i32, %c0_i32_0 : i32, i32, i32
  }
  func.func @transform_2(%arg0: i32, %arg1: i32) -> (i32, i32, i32) {
    %c0_i32 = arith.constant 0 : i32
    %c0_i32_0 = arith.constant 0 : i32
    %c0_i32_1 = arith.constant 0 : i32
    return %arg1, %c0_i32, %c0_i32_0 : i32, i32, i32
  }
  func.func @transform_3(%arg0: i32, %arg1: i32) -> (i32, i32, i32) {
    %c0_i32 = arith.constant 0 : i32
    %c0_i32_0 = arith.constant 0 : i32
    %c0_i32_1 = arith.constant 0 : i32
    return %arg1, %c0_i32, %c0_i32_0 : i32, i32, i32
  }
  func.func @transform_4(%arg0: i32, %arg1: i32) -> (i32, i32, i32) {
    %c0_i32 = arith.constant 0 : i32
    %c0_i32_0 = arith.constant 0 : i32
    %c0_i32_1 = arith.constant 0 : i32
    return %arg1, %c0_i32, %c0_i32_0 : i32, i32, i32
  }
  func.func @transform_5(%arg0: i32, %arg1: i32) -> (i32, i32, i32) {
    %c0_i32 = arith.constant 0 : i32
    %c0_i32_0 = arith.constant 0 : i32
    %c0_i32_1 = arith.constant 0 : i32
    return %arg1, %c0_i32, %c0_i32_0 : i32, i32, i32
  }
  func.func @transform_6(%arg0: i32, %arg1: i32) -> (i32, i32, i32) {
    %c0_i32 = arith.constant 0 : i32
    %c0_i32_0 = arith.constant 0 : i32
    %c0_i32_1 = arith.constant 0 : i32
    return %arg1, %c0_i32, %c0_i32_0 : i32, i32, i32
  }
  func.func @transform_7(%arg0: i32, %arg1: i32) -> (i32, i32) {
    %c0_i32 = arith.constant 0 : i32
    %c0_i32_0 = arith.constant 0 : i32
    %c0_i32_1 = arith.constant 0 : i32
    return %c0_i32, %c0_i32_0 : i32, i32
  }
  func.func @transform_8(%arg0: i32, %arg1: i32) -> (i32, i32) {
    %c0_i32 = arith.constant 0 : i32
    %c0_i32_0 = arith.constant 0 : i32
    %c0_i32_1 = arith.constant 0 : i32
    return %c0_i32, %c0_i32_0 : i32, i32
  }
  func.func @transform_9(%arg0: i32, %arg1: i32) -> (i32, i32, i32) {
    %c0_i32 = arith.constant 0 : i32
    %c0_i32_0 = arith.constant 0 : i32
    %c0_i32_1 = arith.constant 0 : i32
    return %arg0, %c0_i32, %c0_i32_0 : i32, i32, i32
  }
  func.func @transform_10(%arg0: i32, %arg1: i32) -> (i32, i32, i32) {
    %c0_i32 = arith.constant 0 : i32
    %c0_i32_0 = arith.constant 0 : i32
    %c0_i32_1 = arith.constant 0 : i32
    return %arg0, %c0_i32, %c0_i32_0 : i32, i32, i32
  }
}

</mosaic_0001>

<bundles_post_ra>
// kernel: tpu_custom_call.1
= control target key start
LH: loop header
LB: loop body
LE: loop exit
PB: predicated region body
PF: predicated region fallthrough
CT: control target
= control target key end

     0   :  { %s2930_s0 = inlined_call_operand.hbm [shape: f32[2,16,128], index: 0, kind: input, shape index: {}]   ;;  %s2931_s1 = inlined_call_operand.hbm [shape: f32[2,1,16], index: 1, kind: input, shape index: {}]   ;;  %s2932_s2 = inlined_call_operand.hbm [shape: bf16[2,128,384], index: 2, kind: input, shape index: {}]   ;;  %s2933_s3 = inlined_call_operand.hbm [shape: bf16[2,128,128], index: 3, kind: input, shape index: {}]   ;;  %s2934_s4 = inlined_call_operand.hbm [shape: bf16[2,128,256], index: 4, kind: input, shape index: {}]   ;;  %s2935_s5 = inlined_call_operand.hbm [shape: bf16[2,256,128], index: 5, kind: input, shape index: {}]   ;;  %s2936_s6 = inlined_call_operand.hbm [shape: f32[2,8,384], index: 6, kind: input, shape index: {}]   ;;  %s2937_s7 = inlined_call_operand.hbm [shape: bf16[128,128], index: 7, kind: input, shape index: {}]   ;;  %s2938_s8 = inlined_call_operand.vmem [shape: f32[1,128], index: 8, kind: input, shape index: {}]   ;;  %s2939_s9 = inlined_call_operand.hbm [shape: f32[2,1,128], index: 9, kind: output, shape index: {0}]   ;;  %s2940_s10 = inlined_call_operand.hbm [shape: f32[2,1,128], index: 10, kind: output, shape index: {1}]  }
   0x1   :  { %2961 = sst [smem:[#allocation42_spill]] %s2930_s0 }
   0x2   :  { %2962 = sst [smem:[#allocation43_spill]] %s2931_s1 }
   0x3   :  { %2963 = sst [smem:[#allocation44_spill]] %s2932_s2 }
   0x4   :  { %2964 = sst [smem:[#allocation45_spill]] %s2933_s3 }
   0x5   :  { %2965 = sst [smem:[#allocation46_spill]] %s2934_s4 }
   0x6   :  { %2966 = sst [smem:[#allocation47_spill]] %s2935_s5 }
   0x7   :  { %2967 = sst [smem:[#allocation48_spill]] %s2937_s7 }
   0x8   :  { %2968 = sst [smem:[#allocation49_spill]] %s2938_s8 }
   0x9   :  { %2969 = sst [smem:[#allocation50_spill]] %s2939_s9 }
   0xa   :  { %2970 = sst [smem:[#allocation51_spill]] %s2940_s10 }
   0xb   :  { %16 = vsyncpa [#allocation5], 0 }
   0xc   :  { %18 = vsyncpa [#allocation5 + $0x1], 0 }
   0xd   :  { %19 = vsyncpa [#allocation8], 0 }
   0xe   :  { %21 = vsyncpa [#allocation8 + $0x1], 0 }
   0xf   :  { %22 = vsyncpa [#allocation11], 0 }
  0x10   :  { %24 = vsyncpa [#allocation11 + $0x1], 0 }
  0x11   :  { %25 = vsyncpa [#allocation14], 0 }
  0x12   :  { %27 = vsyncpa [#allocation14 + $0x1], 0 }
  0x13   :  { %28 = vsyncpa [#allocation6], 0 }
  0x14   :  { %30 = vsyncpa [#allocation6 + $0x1], 0 }
  0x15   :  { %31 = vsyncpa [#allocation18], 0 }
  0x16   :  { %33 = vsyncpa [#allocation18 + $0x1], 0  ;;  %s2428_s13 = smov 0   ;;  %s2430_s14 = smov 0  }
  0x17   :  { %s2432_s15 = smov 0   ;;  %s2434_s16 = smov 0  }
  0x18   :  { %s2436_s17 = smov 0   ;;  %s2438_s18 = smov 0  }
  0x19   :  { %s2440_s19 = smov 0   ;;  %s2442_s20 = smov 0  }
  0x1a   :  { %s2444_s21 = smov 0   ;;  %s2446_s22 = smov 0  }
  0x1b   :  { %s2448_s23 = smov 0  }
  0x1c LB: > { %2971 = sst [smem:[#allocation31_spill]] %s2326_s14  ;;  %s2482_s24 = sadd.s32 4294967295, %s2362_s23   ;;  %s2362_s23 = sphi %s2448_s23, %s39_s23   ;;  %s2358_s22 = sphi %s2446_s22, %s3020_s22   ;;  %s2354_s21 = sphi %s2444_s21, %s3026_s21   ;;  %s2350_s20 = sphi %s2442_s20, %s3018_s20   ;;  %s2346_s19 = sphi %s2440_s19, %s3025_s19   ;;  %s2342_s18 = sphi %s2438_s18, %s3017_s18   ;;  %s2338_s17 = sphi %s2436_s17, %s3024_s17   ;;  %s2334_s16 = sphi %s2434_s16, %s3023_s16   ;;  %s2330_s15 = sphi %s2432_s15, %s3022_s15   ;;  %s2326_s14 = sphi %s2430_s14, %s3021_s14   ;;  %s2322_s13 = sphi %s2428_s13, %s3014_s13  }
  0x1d   : > { %2972 = sst [smem:[#allocation32_spill]] %s2342_s18  ;;  %p97_p0 = scmp.ne.s32.totalorder %s2326_s14, %s2322_s13 }
  0x1e   : > { %2973 = sst [smem:[#allocation33_spill]] %s2346_s19  ;;  %p2954_p1 = scmp.eq.s32.totalorder %s2482_s24, 0 }
  0x1f   : > { %2974 = sst [smem:[#allocation34_spill]] %s2350_s20  ;;  %p1575_p2 = scmp.ge.s32.totalorder %s2362_s23, 1 }
  0x20   : > { %2975 = sst [smem:[#allocation35_spill]] %s2358_s22  ;;  %p306_p3 = scmp.lt.s32.totalorder %s2362_s23, 5 }
  0x21   : > { %p2490_p4 = por %p97_p0, %p2954_p1  ;;  %s2978_s7 = sld [smem:[#allocation48_spill]] }
  0x22   : > { %p2497_p5 = pnand %p1575_p2, %p306_p3  ;;  %s2364_s30 = smov [#allocation15]  }
  0x23   : > { %s2976_s25 = scalar_select %p2490_p4, 1, 0 }
  0x24   : > { %s2979_s29 = scalar_select %p2497_p5, 1, 0 }
  0x25   : > { %2977 = sst [smem:[#allocation36_spill]] %s2976_s25  ;;  %p1791_p6 = pneg %p2497_p5 }
  0x26   : > { %2980 = sst [smem:[#allocation37_spill]] %s2979_s29  ;;  %s319_s11 = sshll.u32 %s2364_s30, 4  ;;  %s320_s11 = int_to_ptr.vmem [resolvable:$true] %s319_s11 }
  0x27   : > { %s317_s28 = sshll.u32 %s2978_s7, 4  ;;  %p1792_p7 = pnand %p1791_p6, %p2954_p1  ;;  %s318_s28 = int_to_ptr.hbm [resolvable:$true] %s317_s28 }
  0x28   : > { %s2942_s12 = smov 64   ;;  %s2944_s13 = smov 4  }
  0x29   : > { %1794 = dma.hbm_to_vmem [thread:$0]  (!%p1792_p7), %s318_s28, 1024, %s320_s11, [#allocation14], %s2942_s12, %s2942_s12, %s2944_s13  }
  0x2a   : > { %p66_p8 = scmp.eq.s32.totalorder %s2362_s23, 0  ;;  %p91_p9 = scmp.ne.s32.totalorder %s2330_s15, %s2326_s14 }
  0x2b   : > { %p1822_p10 = scmp.lt.s32.totalorder %s2362_s23, 4  ;;  %s2514_s27 = sand.u32 1, %s2362_s23  }
  0x2c   : > { %p93_p11 = por %p91_p9, %p66_p8  ;;  %s2519_s30 = sand.u32 1, %s2330_s15  }
  0x2d   : > { %s1763_s7 = smul.u32 192, %s2354_s21  ;;  %s2982_s2 = sld [smem:[#allocation44_spill]] }
  0x2e   : > { %s1762_s10 = smul.u32 192, %s2519_s30  ;;  %p2525_p12 = pnand %p1822_p10, %p93_p11 }
  0x2f   : > { %s2956_s0 = scalar_lea.sflag [#allocation8], %s2514_s27  ;;  %s2367_s20 = smov 192  }
  0x30   : > { %s357_s9 = scalar_lea.vmem [#allocation7], %s1762_s10  ;;  %s2368_s19 = smov 12  }
  0x31   : > { %s365_s8 = sshll.u32 %s357_s9, 4  ;;  %s1582_s25 = sshll.u32 %s2519_s30, 7  ;;  %s366_s8 = int_to_ptr.vmem [resolvable:$true] %s365_s8 }
  0x32   : > { %s1603_s14 = sshll.u32 %s2354_s21, 7  ;;  %s2983_s4 = sld [smem:[#allocation46_spill]] }
  0x33   : > { %s362_s13 = scalar_lea.hbm %s2982_s2, %s1763_s7  ;;  %s401_s10 = scalar_lea.vmem [#allocation10], %s1582_s25 }
  0x34   : > { %s363_s26 = sshll.u32 %s362_s13, 4  ;;  %s409_s9 = sshll.u32 %s401_s10, 4  ;;  %s364_s26 = int_to_ptr.hbm [resolvable:$true] %s363_s26  ;;  %s410_s9 = int_to_ptr.vmem [resolvable:$true] %s409_s9 }
  0x35   : > { %1801 = dma.hbm_to_vmem [thread:$0]  (!%p2525_p12), %s364_s26, 3072, %s366_s8, %s2956_s0, %s2367_s20, %s2367_s20, %s2368_s19  }
  0x36   : > { %s2955_s11 = scalar_lea.sflag [#allocation11], %s2514_s27  ;;  %s2369_s2 = smov 128  }
  0x37   : > { %s2370_s8 = smov 8   ;;  %s2984_s5 = sld [smem:[#allocation47_spill]] }
  0x38   : > { %s406_s7 = scalar_lea.hbm %s2983_s4, %s1603_s14  ;;  %s423_s12 = scalar_lea.vmem [#allocation12], %s1582_s25 }
  0x39   : > { %s407_s13 = sshll.u32 %s406_s7, 4  ;;  %s431_s7 = sshll.u32 %s423_s12, 4  ;;  %s408_s13 = int_to_ptr.hbm [resolvable:$true] %s407_s13  ;;  %s2552_s7 = int_to_ptr.vmem [resolvable:$true] %s431_s7 }
  0x3a   : > { %1807 = dma.hbm_to_vmem [thread:$0]  (!%p2525_p12), %s408_s13, 2048, %s410_s9, %s2955_s11, %s2369_s2, %s2369_s2, %s2370_s8  }
  0x3b   : > { %s1574_s2 = sadd.s32 4294967294, %s2362_s23   ;;  %s48_s13 = sadd.s32 1, %s2354_s21 }
  0x3c   : > { %p49_p13 = scmp.ge.s32.totalorder %s48_s13, 2  ;;  %s51_s10 = sadd.s32 1, %s2358_s22 }
  0x3d   : > { %s428_s29 = scalar_lea.hbm %s2984_s5, %s1603_s14  ;;  %s58_s14 = sadd.s32 1, %s2342_s18 }
  0x3e   : > { %s429_s26 = sshll.u32 %s428_s29, 4  ;;  %p65_p0 = scmp.ne.s32.totalorder %s2342_s18, %s2338_s17  ;;  %s2550_s26 = int_to_ptr.hbm [resolvable:$true] %s429_s26 }
  0x3f   : > { %s3028_s13 = smov (%p49_p13, %s48_s13), 0  ;;  %s3030_s10 = smov (!%p49_p13, %s51_s10), %s2358_s22 }
  0x40   : > { %2985 = sst [smem:[#allocation38_spill]] %s3028_s13  ;;  %p2568_p2 = por %p66_p8, %p65_p0 }
  0x41   : > { %p71_p3 = scmp.ne.s32.totalorder %s2338_s17, %s2334_s16  ;;  %p53_p6 = scmp.ge.s32.totalorder %s3030_s10, 2 }
  0x42   : > { %s81_s9 = ssub.s32 %s2354_s21, %s3028_s13  ;;  %s2989_s19 = sadd.s32 1, %s2330_s15 }
  0x43   : > { %p2581_p7 = por %p2954_p1, %p71_p3  ;;  %p82_p9 = scmp.eq.s32.totalorder %s81_s9, 0 }
  0x44   : > { %s3032_s10 = smov (%p53_p6, %s3030_s10), 0  ;;  %p267_p8 = scmp.eq.s32.totalorder %s2482_s24, 3 }
  0x45   : > { %2988 = sst [smem:[#allocation39_spill]] %s3032_s10  ;;  %s55_s29 = ssub.s32 %s2358_s22, %s3032_s10 }
  0x46   : > { %s2590_s20 = scalar_select %p82_p9, %s2330_s15, %s2989_s19  }
  0x47   : > { %p56_p11 = scmp.eq.s32.totalorder %s55_s29, 0  ;;  %p273_p13 = scmp.eq.s32.totalorder %s1574_s2, 3 }
  0x48   : > { %2990 = sst [smem:[#allocation40_spill]] %s2590_s20  ;;  %p2598_p1 = por %p267_p8, %p65_p0 }
  0x49   : > { %s336_s9 = sand.u32 1, %s2342_s18   ;;  %p2609_p6 = por %p273_p13, %p71_p3 }
  0x4a   : > { %s2604_s11 = scalar_select %p56_p11, %s2342_s18, %s58_s14  }
  0x4b   : > { %s2994_s1 = sld [smem:[#allocation43_spill]]  ;;  %s339_s2 = scalar_lea.vmem [#allocation4], %s336_s9 }
  0x4c   : > { %2992 = sst [smem:[#allocation41_spill]] %s2604_s11  ;;  %s346_s29 = sshll.u32 %s339_s2, 4  ;;  %s347_s29 = int_to_ptr.vmem [resolvable:$true] %s346_s29 }
  0x4d   : > { %p1796_p0 = pnand %p1822_p10, %p2568_p2  ;;  %s1579_s14 = sshll.u32 %s2519_s30, 6 }
  0x4e   : > { %s1602_s13 = sshll.u32 %s2354_s21, 6  ;;  %s2995_s3 = sld [smem:[#allocation45_spill]] }
  0x4f   : > { %s379_s11 = scalar_lea.vmem [#allocation9], %s1579_s14  ;;  %s2996_s18 = smov 4  }
  0x50   : > { %s387_s2 = sshll.u32 %s379_s11, 4  ;;  %s2997_s25 = smov 64   ;;  %s388_s2 = int_to_ptr.vmem [resolvable:$true] %s387_s2 }
  0x51   : > { %s342_s5 = scalar_lea.hbm %s2994_s1, %s2358_s22  ;;  %s337_s1 = scalar_lea.sflag [#allocation5], %s336_s9 }
  0x52   : > { %s344_s10 = sshll.u32 %s342_s5, 4  ;;  %s2998_s20 = scalar_lea.sflag [#allocation8], %s2514_s27  ;;  %s345_s10 = int_to_ptr.hbm [resolvable:$true] %s344_s10 }
  0x53   : > { %1798 = dma.hbm_to_vmem [thread:$0]  (!%p1796_p0), %s345_s10, 16, %s347_s29, %s337_s1  }
  0x54   : > { %s384_s5 = scalar_lea.hbm %s2995_s3, %s1602_s13  ;;  %s2999_s13 = scalar_lea.sflag [#allocation11], %s2514_s27 }
  0x55   : > { %s385_s22 = sshll.u32 %s384_s5, 4  ;;  %s1764_s1 = smul.u32 24, %s2519_s30  ;;  %s386_s22 = int_to_ptr.hbm [resolvable:$true] %s385_s22 }
  0x56   : > { %1804 = dma.hbm_to_vmem [thread:$0]  (!%p2525_p12), %s386_s22, 1024, %s388_s2, %s2998_s20, %s2997_s25, %s2997_s25, %s2996_s18  }
  0x57   : > { %1810 = dma.hbm_to_vmem [thread:$0]  (!%p2525_p12), %s2550_s26, 2048, %s2552_s7, %s2999_s13, %s2997_s25, %s2997_s25, %s2996_s18  }
  0x58   : > { %s1765_s10 = smul.u32 24, %s2354_s21  ;;  %s445_s14 = scalar_lea.vmem [#allocation13], %s1764_s1 }
  0x59   : > { %s454_s4 = sshll.u32 %s445_s14, 4  ;;  %s442_s5 = scalar_lea.sflag [#allocation14], %s2514_s27  ;;  %s455_s4 = int_to_ptr.vmem [resolvable:$true] %s454_s4 }
  0x5a   : > { %s450_s11 = scalar_lea.hbm %s2936_s6, %s1765_s10  ;;  %463 = sbr.rel (%p2497_p5) target bundleno = 1771 (0x6eb), region = 52 }
  0x5b   : > { %s452_s19 = sshll.u32 %s450_s11, 4  ;;  %s2653_s18 = sand.u32 (!%p2497_p5), 1, %s2338_s17   ;;  %s453_s19 = int_to_ptr.hbm [resolvable:$true] %s452_s19 }
  0x5c   : > { %1813 = dma.hbm_to_vmem [thread:$0]  (!%p2525_p12), %s453_s19, 384, %s455_s4, %s442_s5  }
  0x5d   : > { %s466_s30 = scalar_lea.sflag (!%p2497_p5), [#allocation5], %s2653_s18 }
  0x5f   : > { %2289 = dma.done.wait (%p2581_p7), %s466_s30, 16  }
  0x60   : > { %2291 = vsyncadd (%p2581_p7), %s466_s30, 4294967280  ;;  %s3001_s27 = sld [smem:[#allocation31_spill]]  ;;  %s474_s7 = sand.u32 1, %s2482_s24  }
  0x61   : > { %s475_s25 = scalar_lea.sflag [#allocation8], %s474_s7 }
  0x66   : > { %s476_s20 = sand.u32 1, %s3001_s27  }
  0x67   : > { %s1766_s2 = smul.u32 192, %s476_s20 }
  0x69   : > { %s2663_s13 = scalar_lea.vmem [#allocation7], %s1766_s2 }
  0x6a   : > { %2293 = dma.done.wait (%p2490_p4), %s475_s25, 4096  }
  0x6b   : > { %2295 = vsyncadd (%p2490_p4), %s475_s25, 4294963200  ;;  %s1590_s1 = sshll.u32 %s476_s20, 6  ;;  %s1591_s10 = sshll.u32 %s476_s20, 7 }
  0x6c   : > { %s2669_s9 = scalar_lea.vmem [#allocation9], %s1590_s1  ;;  %s495_s8 = scalar_lea.sflag [#allocation11], %s474_s7 }
  0x6d   : > { %s2671_s29 = scalar_lea.vmem [#allocation10], %s1591_s10 }
  0x6e   : > { %2297 = dma.done.wait (%p2490_p4), %s495_s8, 4096  }
  0x6f   : > { %2299 = vsyncadd (%p2490_p4), %s495_s8, 4294963200  ;;  %s1767_s11 = smul.u32 24, %s476_s20  ;;  %s2677_s14 = scalar_lea.vmem [#allocation12], %s1591_s10 }
  0x70   : > { %s515_s4 = scalar_lea.sflag [#allocation14], %s474_s7 }
  0x71   : > { %s2679_s19 = scalar_lea.vmem [#allocation13], %s1767_s11 }
  0x72   : > { %2301 = dma.done.wait (%p2490_p4), %s515_s4, 384  }
  0x73   : > { %2303 = vsyncadd (%p2490_p4), %s515_s4, 4294966912  ;;  %p3003_p5 = scmp.eq.s32.totalorder %s2482_s24, 0 }
  0x75   : > { %2305 = dma.done.wait (%p3003_p5), [#allocation14], 1024   ;;  %p3004_p10 = pmov %p3003_p5 }
  0x76   : > { %s3005_s5 = sld [smem:[#allocation33_spill]]  ;;  %s2371_s1 = smov [#allocation2]  }
  0x77   : > { %2307 = vsyncadd (%p3004_p10), [#allocation14], 4294966272  ;;  %s3006_s22 = sld [smem:[#allocation34_spill]]  ;;  %s601_s10 = sshll.u32 %s2371_s1, 4  ;;  %s602_s10 = int_to_ptr.vmem [resolvable:$true] %s601_s10 }
  0x78   : > { %s3007_s20 = sld [smem:[#allocation42_spill]] }
  0x7c   : > { %p1824_p12 = scmp.eq.s32.totalorder %s3005_s5, 0 }
  0x7d   : > { %s1595_s30 = sshll.u32 %s3006_s22, 4 }
  0x7e   : > { %s3008_s2 = smov %s3007_s20  ;;  %s591_s25 = scalar_lea.hbm %s3007_s20, %s1595_s30 }
  0x7f   : > { %s599_s8 = sshll.u32 %s591_s25, 4  ;;  %s2166_s22 = scalar_lea.hbm %s3008_s2, 32  ;;  %s600_s8 = int_to_ptr.hbm [resolvable:$true] %s599_s8 }
  0x80   : > { %s2160_s28 = sshra.s32 %s600_s8, 4  ;;  %s2161_s28 = int_to_ptr.hbm [resolvable:$true] %s2160_s28 }
  0x81   : > { %s2162_s11 = scalar_lea.hbm %s2161_s28, 16  ;;  %p2167_p7 = scmp.lt.s32.totalorder %s2161_s28, %s3008_s2 }
  0x82   : > { %p2163_p4 = scmp.ne.s32.totalorder %s2161_s28, %s2162_s11  ;;  %p2168_p9 = scmp.lt.s32.totalorder %s2166_s22, %s2162_s11 }
  0x84   : > { %p2164_p2 = pnand %p2163_p4, %p1824_p12  ;;  %p2169_p8 = por %p2168_p9, %p2167_p7 }
  0x86   : > { %p2165_p3 = pneg %p2164_p2 }
  0x88   : > { %p2170_p11 = pnand %p2169_p8, %p2165_p3 }
  0x8a   : > { %2173 = shalt.err (!%p2170_p11)  }
  0x8b   : > { %1785 = dma.hbm_to_vmem [thread:$0]  (%p1824_p12), %s600_s8, 256, %s602_s10, [#allocation3] }
  0x8c   : > { %s579_s30 = scalar_lea.vmem [#allocation16], %s2653_s18  ;;  %s585_s27 = scalar_lea.vmem [#allocation17], %s2653_s18 }
  0x8d   : > { %2309 = dma.done.wait (%p1824_p12), [#allocation3], 256 }
  0x8e   : > { %2311 = vsyncadd (%p1824_p12), [#allocation3], 4294967040  ;;  %v644_v0 = vld [vmem:[%s2663_s13 + $0xb4] sm:$0xff]  ;;  %v642_v1 = vld [vmem:[%s2663_s13 + $0xa8] sm:$0xff]  ;;  %s3009_s3 = scalar_lea.vmem [#allocation4], %s2653_s18  ;;  %vm793_vm0 = vcmask 130048  }
  0x8f   : > { %v640_v2 = vld [vmem:[%s2663_s13 + $0x9c] sm:$0xff]  ;;  %v692_v3 = vunpack.c.h.bf16 %v644_v0  ;;  %v689_v4 = vunpack.c.h.bf16 %v642_v1  ;;  %v691_v5 = vunpack.c.l.bf16 %v644_v0  ;;  %v638_v6 = vld [vmem:[%s2663_s13 + $0x90] sm:$0xff]  ;;  %v688_v7 = vunpack.c.l.bf16 %v642_v1  ;;  %v636_v10 = vld [vmem:[%s2663_s13 + $0x84] sm:$0xff]  ;;  %p1598_p13 = scmp.ne.s32.totalorder %s3005_s5, 1 }
  0x90   : > { %v686_v8 = vunpack.c.h.bf16 %v640_v2  ;;  %v685_v9 = vunpack.c.l.bf16 %v640_v2  ;;  %v683_v11 = vunpack.c.h.bf16 %v638_v6  ;;  %v682_v12 = vunpack.c.l.bf16 %v638_v6  ;;  %v634_v13 = vld [vmem:[%s2663_s13 + $0x78] sm:$0xff]  ;;  %v632_v16 = vld [vmem:[%s2663_s13 + $0x6c] sm:$0xff]  ;;  %v630_v19 = vld [vmem:[%s2663_s13 + $0x60] sm:$0xff] }
  0x91   : > { %720 = vmatpush.msra.mxu1 %v692_v3  ;;  %697 = vmatpush.msra.mxu0 %v691_v5  ;;  %v680_v14 = vunpack.c.h.bf16 %v636_v10  ;;  %v679_v15 = vunpack.c.l.bf16 %v636_v10  ;;  %v677_v17 = vunpack.c.h.bf16 %v634_v13  ;;  %v676_v18 = vunpack.c.l.bf16 %v634_v13  ;;  %v628_v22 = vld [vmem:[%s2663_s13 + $0x54] sm:$0xff]  ;;  %v626_v25 = vld [vmem:[%s2663_s13 + $0x48] sm:$0xff]  ;;  %v624_v28 = vld [vmem:[%s2663_s13 + $0x3c] sm:$0xff] }
  0x92   : > { %v674_v20 = vunpack.c.h.bf16 %v632_v16  ;;  %v673_v21 = vunpack.c.l.bf16 %v632_v16  ;;  %v671_v23 = vunpack.c.h.bf16 %v630_v19  ;;  %v670_v24 = vunpack.c.l.bf16 %v630_v19  ;;  %v622_v31 = vld [vmem:[%s2663_s13 + $0x30] sm:$0xff]  ;;  %v620_v34 = vld [vmem:[%s2663_s13 + $0x24] sm:$0xff]  ;;  %v618_v37 = vld [vmem:[%s2663_s13 + $0x18] sm:$0xff] }
  0x93   : > { %721 = vmatpush.msra.mxu1 %v689_v4  ;;  %698 = vmatpush.msra.mxu0 %v688_v7  ;;  %v668_v26 = vunpack.c.h.bf16 %v628_v22  ;;  %v667_v27 = vunpack.c.l.bf16 %v628_v22  ;;  %v665_v29 = vunpack.c.h.bf16 %v626_v25  ;;  %v664_v30 = vunpack.c.l.bf16 %v626_v25  ;;  %v616_v40 = vld [vmem:[%s2663_s13 + $0xc] sm:$0xff]  ;;  %v614_v43 = vld [vmem:[%s2663_s13] sm:$0xff]  ;;  %v2730_v49 = vld [vmem:[#allocation2 + $0x8] sm:$0xff] }
  0x94   : > { %v662_v32 = vunpack.c.h.bf16 %v624_v28  ;;  %v661_v33 = vunpack.c.l.bf16 %v624_v28  ;;  %v659_v35 = vunpack.c.h.bf16 %v622_v31  ;;  %v658_v36 = vunpack.c.l.bf16 %v622_v31  ;;  %v2726_v48 = vld [vmem:[#allocation2] sm:$0xff]  ;;  %v2739_v53 = vld [vmem:[%s2679_s19] sm:$0xff]  ;;  %v615_v31 = vld [vmem:[%s2663_s13 + $0x8] sm:$0xf] }
  0x95   : > { %722 = vmatpush.msra.mxu1 %v686_v8  ;;  %699 = vmatpush.msra.mxu0 %v685_v9  ;;  %v656_v38 = vunpack.c.h.bf16 %v620_v34  ;;  %v655_v39 = vunpack.c.l.bf16 %v620_v34  ;;  %v653_v41 = vunpack.c.h.bf16 %v618_v37  ;;  %v652_v42 = vunpack.c.l.bf16 %v618_v37  ;;  %v2735_v51 = vld [vmem:[%s2679_s19 + $0x8] sm:$0xff]  ;;  %v645_v62 = vld [vmem:[%s2663_s13 + $0xbc] sm:$0xf]  ;;  %v643_v63 = vld [vmem:[%s2663_s13 + $0xb0] sm:$0xf] }
  0x96   : > { %v650_v44 = vunpack.c.h.bf16 %v616_v40  ;;  %v649_v45 = vunpack.c.l.bf16 %v616_v40  ;;  %v647_v46 = vunpack.c.h.bf16 %v614_v43  ;;  %v646_v47 = vunpack.c.l.bf16 %v614_v43  ;;  %v641_v0 = vld [vmem:[%s2663_s13 + $0xa4] sm:$0xf]  ;;  %v639_v3 = vld [vmem:[%s2663_s13 + $0x98] sm:$0xf]  ;;  %v637_v5 = vld [vmem:[%s2663_s13 + $0x8c] sm:$0xf] }
  0x97   : > { %723 = vmatpush.msra.mxu1 %v683_v11  ;;  %700 = vmatpush.msra.mxu0 %v682_v12  ;;  %v695_v52 = vperm.slane %v2735_v51, 0  ;;  %v694_v57 = vperm.slane %v2739_v53, 0  ;;  %v693_v1 = vunpack.c.l.bf16 %v645_v62  ;;  %v690_v2 = vunpack.c.l.bf16 %v643_v63  ;;  %v635_v7 = vld [vmem:[%s2663_s13 + $0x80] sm:$0xf]  ;;  %v633_v9 = vld [vmem:[%s2663_s13 + $0x74] sm:$0xf] }
  0x98   : > { %v687_v4 = vunpack.c.l.bf16 %v641_v0  ;;  %v684_v6 = vunpack.c.l.bf16 %v639_v3  ;;  %v681_v8 = vunpack.c.l.bf16 %v637_v5  ;;  %v678_v10 = vunpack.c.l.bf16 %v635_v7  ;;  %v631_v11 = vld [vmem:[%s2663_s13 + $0x68] sm:$0xf]  ;;  %v629_v13 = vld [vmem:[%s2663_s13 + $0x5c] sm:$0xf] }
  0x99   : > { %724 = vmatpush.msra.mxu1 %v680_v14  ;;  %701 = vmatpush.msra.mxu0 %v679_v15  ;;  %v675_v12 = vunpack.c.l.bf16 %v633_v9  ;;  %v672_v14 = vunpack.c.l.bf16 %v631_v11  ;;  %v627_v15 = vld [vmem:[%s2663_s13 + $0x50] sm:$0xf]  ;;  %v669_v16 = vunpack.c.l.bf16 %v629_v13  ;;  %v1737_v62 = vld [vmem:[%s2669_s9 + $0x28] sm:$0xff]  }
  0x9a   : > { %743 = vmatpush.msra.mxu2 %v693_v1  ;;  %v666_v19 = vunpack.c.l.bf16 %v627_v15  ;;  %v1628_v0 = vunpack.c.h.bf16 %v1737_v62  ;;  %v1736_v1 = vld [vmem:[%s2669_s9 + $0x20] sm:$0xff]   ;;  %v1733_v11 = vld [vmem:[%s2669_s9 + $0x8] sm:$0xff]  }
  0x9b   : > { %725 = vmatpush.msra.mxu1 %v677_v17  ;;  %702 = vmatpush.msra.mxu0 %v676_v18  ;;  %v625_v17 = vld [vmem:[%s2663_s13 + $0x44] sm:$0xf]  ;;  %v1923_v18 = vld [vmem:[%s3009_s3] ss:$0 sm:$0xff]  ;;  %v1624_v3 = vunpack.c.h.bf16 %v1736_v1  ;;  %v1623_v5 = vunpack.c.l.bf16 %v1736_v1 }
  0x9c   : > { %744 = vmatpush.msra.mxu2 %v690_v2  ;;  %v1627_v2 = vunpack.c.l.bf16 %v1737_v62 }
  0x9d   : > { %726 = vmatpush.msra.mxu1 %v674_v20  ;;  %703 = vmatpush.msra.mxu0 %v673_v21  ;;  %v623_v20 = vld [vmem:[%s2663_s13 + $0x38] sm:$0xf]  ;;  %v663_v21 = vunpack.c.l.bf16 %v625_v17  ;;  %v1606_v17 = vld [vmem:[%s2669_s9] sm:$0xff]  }
  0x9e   : > { %745 = vmatpush.msra.mxu2 %v687_v4  ;;  %v660_v25 = vunpack.c.l.bf16 %v623_v20  ;;  %v1735_v4 = vld [vmem:[%s2669_s9 + $0x18] sm:$0xff]  }
  0x9f   : > { %727 = vmatpush.msra.mxu1 %v671_v23  ;;  %704 = vmatpush.msra.mxu0 %v670_v24  ;;  %v621_v23 = vld [vmem:[%s2663_s13 + $0x2c] sm:$0xf]  ;;  %v1620_v7 = vunpack.c.h.bf16 %v1735_v4  ;;  %v1619_v9 = vunpack.c.l.bf16 %v1735_v4 }
  0xa0   : > { %746 = vmatpush.msra.mxu2 %v684_v6  ;;  %v657_v28 = vunpack.c.l.bf16 %v621_v23 }
  0xa1   : > { %728 = vmatpush.msra.mxu1 %v668_v26  ;;  %705 = vmatpush.msra.mxu0 %v667_v27  ;;  %v619_v26 = vld [vmem:[%s2663_s13 + $0x20] sm:$0xf] }
  0xa2   : > { %747 = vmatpush.msra.mxu2 %v681_v8  ;;  %v1734_v8 = vld [vmem:[%s2669_s9 + $0x10] sm:$0xff]  }
  0xa3   : > { %729 = vmatpush.msra.mxu1 %v665_v29  ;;  %706 = vmatpush.msra.mxu0 %v664_v30  ;;  %v617_v29 = vld [vmem:[%s2663_s13 + $0x14] sm:$0xf]  ;;  %v654_v30 = vunpack.c.l.bf16 %v619_v26  ;;  %v1615_v13 = vunpack.c.l.bf16 %v1734_v8 }
  0xa4   : > { %748 = vmatpush.msra.mxu2 %v678_v10  ;;  %v1616_v10 = vunpack.c.h.bf16 %v1734_v8 }
  0xa5   : > { %730 = vmatpush.msra.mxu1 %v662_v32  ;;  %707 = vmatpush.msra.mxu0 %v661_v33  ;;  %v651_v32 = vunpack.c.l.bf16 %v617_v29 }
  0xa6   : > { %749 = vmatpush.msra.mxu2 %v675_v12 }
  0xa7   : > { %731 = vmatpush.msra.mxu1 %v659_v35  ;;  %708 = vmatpush.msra.mxu0 %v658_v36  ;;  %v648_v35 = vunpack.c.l.bf16 %v615_v31 }
  0xa8   : > { %750 = vmatpush.msra.mxu2 %v672_v14 }
  0xa9   : > { %732 = vmatpush.msra.mxu1 %v656_v38  ;;  %709 = vmatpush.msra.mxu0 %v655_v39 }
  0xaa   : > { %751 = vmatpush.msra.mxu2 %v669_v16  ;;  %v1612_v16 = vunpack.c.h.bf16 %v1733_v11 }
  0xab   : > { %733 = vmatpush.msra.mxu1 %v653_v41  ;;  %710 = vmatpush.msra.mxu0 %v652_v42 }
  0xac   : > { %752 = vmatpush.msra.mxu2 %v666_v19  ;;  %v1608_v19 = vunpack.c.h.bf16 %v1606_v17 }
  0xad   : > { %734 = vmatpush.msra.mxu1 %v650_v44  ;;  %711 = vmatpush.msra.mxu0 %v649_v45 }
  0xae   : > { %753 = vmatpush.msra.mxu2 %v663_v21 }
  0xaf   : > { %735 = vmatpush.msra.mxu1 %v647_v46  ;;  %712 = vmatpush.msra.mxu0 %v646_v47 }
  0xb0   : > { %736 = vmatmul.f32.vlgmr.msra.gmra.mxu1 %v2726_v48  ;;  %713 = vmatmul.f32.vlgmr.msra.gmra.mxu0 %v2726_v48 }
  0xb1   : > { %754 = vmatpush.msra.mxu2 %v660_v25  ;;  %v877_v25 = vperm.slane %v2739_v53, 1 }
  0xb3   : > { %755 = vmatpush.msra.mxu2 %v657_v28 }
  0xb5   : > { %756 = vmatpush.msra.mxu2 %v654_v30 }
  0xb7   : > { %757 = vmatpush.msra.mxu2 %v651_v32 }
  0xb8   : > { %739 = vmatmul.f32.gmra.mxu1 %v2730_v49  ;;  %716 = vmatmul.f32.gmra.mxu0 %v2730_v49 }
  0xb9   : > { %758 = vmatpush.msra.mxu2 %v648_v35 }
  0xba   : > { %759 = vmatmul.f32.vlgmr.msra.gmra.mxu2 %v2726_v48 }
  0xc2   : > { %762 = vmatmul.f32.gmra.mxu2 %v2730_v49 }
 0x12d   : > { %v737_v50 = vpop.f32.mrf.mxu1  ;;  %v714_v56 = vpop.f32.mrf.mxu0 }
 0x12e   : > { %v738_v58 = vadd.f32 %v737_v50, %v695_v52  ;;  %v715_v59 = vadd.f32 %v714_v56, %v694_v57  ;;  %v613_v50 = vld [vmem:[%s2679_s19 + $0x10] sm:$0xff] }
 0x135   : > { %v740_v54 = vpop.f32.mrf.mxu1  ;;  %v717_v60 = vpop.f32.mrf.mxu0 }
 0x136   : > { %v741_v55 = vadd.f32 %v740_v54, %v695_v52  ;;  %v718_v61 = vadd.f32 %v717_v60, %v694_v57  ;;  %v696_v52 = vperm.slane %v613_v50, 0  ;;  %v1739_v57 = vld [vmem:[%s2669_s9 + $0x38] sm:$0xff]  }
 0x137   : > { %v1635_v60 = vunpack.c.l.bf16 %v1739_v57 }
 0x138   : > { %784 = vmatpush.xpose.msrb.mxu0 %v741_v55 }
 0x13c   : > { %785 = vmatpush.xpose.msrb.mxu0 %v738_v58  ;;  %v1738_v58 = vld [vmem:[%s2669_s9 + $0x30] sm:$0xff]   ;;  %s3010_s9 = sld [smem:[#allocation49_spill]] (!%p1598_p13) }
 0x13d   : > { %v760_v47 = vpop.f32.mrf.mxu2  ;;  %v1631_v63 = vunpack.c.l.bf16 %v1738_v58 }
 0x13e   : > { %v761_v55 = vadd.f32 %v760_v47, %v696_v52 }
 0x13f   : > { %786 = vmatmul.f32.vlgmr.msrb.gmra.mxu0 %v715_v59  ;;  %v1636_v59 = vunpack.c.h.bf16 %v1739_v57 }
 0x145   : > { %v763_v54 = vpop.f32.mrf.mxu2 }
 0x146   : > { %v764_v56 = vadd.f32 %v763_v54, %v696_v52  ;;  %v970_v52 = vld [vmem:[%s2671_s29 + $0x50] sm:$0xff] }
 0x147   : > { %789 = vmatmul.f32.gmra.mxu0 %v718_v61  ;;  %v1632_v61 = vunpack.c.h.bf16 %v1738_v58  ;;  %v996_v54 = vunpack.c.l.bf16 %v970_v52 }
 0x148   : > { %836 = vmatpush.msra.mxu3 %v764_v56  ;;  %v969_v56 = vld [vmem:[%s2671_s29 + $0x48] sm:$0xff] }
 0x149   : > { %v994_v58 = vunpack.c.l.bf16 %v969_v56 }
 0x14a   : > { %837 = vmatpush.msra.mxu3 %v761_v55  ;;  %v997_v55 = vunpack.c.h.bf16 %v970_v52 }
 0x14c   : > { %878 = vmatpush.msrb.mxu3 %v1636_v59  ;;  %v995_v59 = vunpack.c.h.bf16 %v969_v56 }
 0x14e   : > { %879 = vmatpush.msrb.mxu3 %v1635_v60  ;;  %v968_v60 = vld [vmem:[%s2671_s29 + $0x40] sm:$0xff] }
 0x14f   : > { %v993_v62 = vunpack.c.h.bf16 %v968_v60 }
 0x150   : > { %880 = vmatpush.msrb.mxu3 %v1632_v61  ;;  %v992_v61 = vunpack.c.l.bf16 %v968_v60 }
 0x152   : > { %881 = vmatpush.msrb.mxu3 %v1631_v63  ;;  %v967_v63 = vld [vmem:[%s2671_s29 + $0x38] sm:$0xff] }
 0x153   : > { %v990_v1 = vunpack.c.l.bf16 %v967_v63 }
 0x154   : > { %882 = vmatpush.msrb.mxu3 %v1628_v0 }
 0x156   : > { %883 = vmatpush.msrb.mxu3 %v1627_v2  ;;  %v991_v2 = vunpack.c.h.bf16 %v967_v63 }
 0x158   : > { %884 = vmatpush.msrb.mxu3 %v1624_v3  ;;  %v966_v3 = vld [vmem:[%s2671_s29 + $0x30] sm:$0xff] }
 0x159   : > { %v988_v4 = vunpack.c.l.bf16 %v966_v3 }
 0x15a   : > { %885 = vmatpush.msrb.mxu3 %v1623_v5  ;;  %v989_v5 = vunpack.c.h.bf16 %v966_v3 }
 0x15c   : > { %886 = vmatpush.msrb.mxu3 %v1620_v7 }
 0x15e   : > { %887 = vmatpush.msrb.mxu3 %v1619_v9 }
 0x160   : > { %888 = vmatpush.msrb.mxu3 %v1616_v10  ;;  %v964_v10 = vld [vmem:[%s2671_s29 + $0x20] sm:$0xff] }
 0x162   : > { %889 = vmatpush.msrb.mxu3 %v1615_v13  ;;  %v963_v13 = vld [vmem:[%s2671_s29 + $0x18] sm:$0xff] }
 0x164   : > { %890 = vmatpush.msrb.mxu3 %v1612_v16  ;;  %v983_v16 = vunpack.c.h.bf16 %v963_v13 }
 0x1bc   : > { %v787_v22 = vpop.f32.mrf.mxu0 }
 0x1bd   : > { %v788_v24 = vadd.f32 %v1923_v18, %v787_v22  ;;  %v1607_v22 = vunpack.c.l.bf16 %v1606_v17  ;;  %v962_v17 = vld [vmem:[%s2671_s29 + $0x10] sm:$0xff] }
 0x1bf   : > { %v794_v27 = vsel %vm793_vm0, %v788_v24, -inf }
 0x1c0   : > { %795 = vmax.xlane.f32.xlu0 %v794_v27 }
 0x1c4   : > { %v790_v33 = vpop.f32.mrf.mxu0 }
 0x1c5   : > { %v791_v34 = vadd.f32 %v1923_v18, %v790_v33  ;;  %v1611_v18 = vunpack.c.l.bf16 %v1733_v11  ;;  %v984_v11 = vunpack.c.l.bf16 %v964_v10 }
 0x1c7   : > { %v797_v36 = vsel %vm793_vm0, %v791_v34, -inf  ;;  %891 = vmatpush.msrb.mxu3 %v1611_v18 }
 0x1c8   : > { %798 = vmax.xlane.f32.xlu0 %v797_v36 }
 0x1c9   : > { %892 = vmatpush.msrb.mxu3 %v1608_v19  ;;  %v980_v19 = vunpack.c.l.bf16 %v962_v17 }
 0x1cb   : > { %893 = vmatpush.msrb.mxu3 %v1607_v22  ;;  %v960_v22 = vld [vmem:[%s2671_s29] sm:$0xff] }
 0x233   : > { %v796_v37 = vpop.xlane.xlu0 %795 }
 0x234   : > { %v800_v38 = vsub.f32 %v788_v24, %v796_v37 }
 0x236   : > { %v802_v39 = vmul.f32 1.442695, %v800_v38  ;;  %v2372_v38 = vmov 128.0  }
 0x238   : > { %1924 = vpow2.f32 %v802_v39  ;;  %v973_v39 = vld [vmem:[%s2671_s29 + $0x68] sm:$0xff] }
 0x23b   : > { %v799_v40 = vpop.xlane.xlu0 %798 }
 0x23c   : > { %v801_v41 = vsub.f32 %v791_v34, %v799_v40  ;;  %v1002_v40 = vunpack.c.l.bf16 %v973_v39 }
 0x23e   : > { %v1925_v42 = vpop.eup %1924  ;;  %v804_v43 = vmul.f32 1.442695, %v801_v41  ;;  %v1003_v41 = vunpack.c.h.bf16 %v973_v39 }
 0x23f   : > { %v806_v44 = vsel %vm793_vm0, %v1925_v42, 0.0 }
 0x240   : > { %1926 = vpow2.f32 %v804_v43  ;;  %807 = vadd.xlane.f32.xlu1 %v806_v44 }
 0x246   : > { %v1927_v45 = vpop.eup %1926 }
 0x247   : > { %v809_v46 = vsel %vm793_vm0, %v1927_v45, 0.0 }
 0x248   : > { %810 = vadd.xlane.f32.xlu1 %v809_v46 }
 0x2b3   : > { %v808_v6 = vpop.xlane.xlu1 %807 }
 0x2b4   : > { %1928 = vrcp.f32 %v808_v6  ;;  %v965_v6 = vld [vmem:[%s2671_s29 + $0x28] sm:$0xff] }
 0x2b5   : > { %v986_v8 = vunpack.c.l.bf16 %v965_v6  ;;  %v987_v9 = vunpack.c.h.bf16 %v965_v6 }
 0x2ba   : > { %v1929_v12 = vpop.eup %1928 }
 0x2bb   : > { %v811_v14 = vpop.xlane.xlu1 %810  ;;  %v814_v15 = vmul.f32 %v1929_v12, %v1925_v42  ;;  %v972_v42 = vld [vmem:[%s2671_s29 + $0x60] sm:$0xff]  ;;  %v985_v12 = vunpack.c.h.bf16 %v964_v10 }
 0x2bc   : > { %1930 = vrcp.f32 %v811_v14  ;;  %v1000_v43 = vunpack.c.l.bf16 %v972_v42  ;;  %v1001_v44 = vunpack.c.h.bf16 %v972_v42  ;;  %v1754_v42 = vld [vmem:[%s2677_s14 + $0x78] sm:$0xff]  }
 0x2bd   : > { %1596 = vmatmul.msk.f32.vlgmr.msra.gmra.mxu3 %vm793_vm0, %v814_v15  ;;  %1932 = vrcp.f32 %v2372_v38  ;;  %v982_v15 = vunpack.c.l.bf16 %v963_v13 }
 0x2c2   : > { %v1931_v20 = vpop.eup %1930 }
 0x2c3   : > { %v815_v21 = vmul.f32 %v1931_v20, %v1927_v45  ;;  %v971_v45 = vld [vmem:[%s2671_s29 + $0x58] sm:$0xff]  ;;  %v1933_v50 = vpop.eup %1932  ;;  %v981_v20 = vunpack.c.h.bf16 %v962_v17  ;;  %v1752_v17 = vld [vmem:[%s2677_s14 + $0x68] sm:$0xff]  }
 0x2c4   : > { %v998_v46 = vunpack.c.l.bf16 %v971_v45  ;;  %v999_v47 = vunpack.c.h.bf16 %v971_v45  ;;  %v908_v57 = vmul.f32 128.0, %v1933_v50  ;;  %vm912_vm1 = vweird.f32 %v1933_v50 }
 0x2c5   : > { %1597 = vmatmul.msk.f32.gmra.mxu3 %vm793_vm0, %v815_v21  ;;  %v961_v21 = vld [vmem:[%s2671_s29 + $0x8] sm:$0xff]  ;;  %v1700_v45 = vunpack.c.h.bf16 %v1754_v42 }
 0x2c6   : > { %v909_v0 = vsub.f32 1.0, %v908_v57 }
 0x2c7   : > { %1180 = vmatpush.msra.mxu3 %v1700_v45  ;;  %v1747_v45 = vld [vmem:[%s2677_s14 + $0x40] sm:$0xff]  }
 0x2c8   : > { %v910_v7 = vmul.f32 %v1933_v50, %v909_v0 }
 0x2ca   : > { %v911_v14 = vadd.f32 %v1933_v50, %v910_v7 }
 0x340   : > { %v839_v23 = vpop.f32.mrf.mxu3 }
 0x341   : > { %894 = vmatmul.f32.vlgmr.msrb.gmra.mxu3 %v839_v23  ;;  %v978_v23 = vunpack.c.l.bf16 %v961_v21 }
 0x348   : > { %v842_v24 = vpop.f32.mrf.mxu3 }
 0x349   : > { %897 = vmatmul.f32.gmra.mxu3 %v842_v24  ;;  %v979_v24 = vunpack.c.h.bf16 %v961_v21  ;;  %v1743_v21 = vld [vmem:[%s2677_s14 + $0x20] sm:$0xff]  }
 0x3c4   : > { %v895_v26 = vpop.f32.mrf.mxu3 }
 0x3c5   : > { %v896_v27 = vadd.f32 %v895_v26, %v877_v25  ;;  %v976_v26 = vunpack.c.l.bf16 %v960_v22 }
 0x3c7   : > { %v2779_v28 = vadd.f32 %v896_v27, %v2726_v48  ;;  %v975_v48 = vld [vmem:[%s2671_s29 + $0x78] sm:$0xff]  ;;  %v977_v27 = vunpack.c.h.bf16 %v960_v22  ;;  %v1751_v22 = vld [vmem:[%s2677_s14 + $0x60] sm:$0xff]  }
 0x3c8   : > { %v1006_v34 = vunpack.c.l.bf16 %v975_v48  ;;  %v1007_v35 = vunpack.c.h.bf16 %v975_v48 }
 0x3c9   : > { %903 = vadd.xlane.f32.xlu2 %v2779_v28  ;;  %v916_v32 = vmul.f32 %v2779_v28, %v2779_v28 }
 0x3ca   : > { %1010 = vmatpush.msra.mxu0 %v1006_v34  ;;  %1033 = vmatpush.msrb.mxu1 %v1007_v35 }
 0x3cc   : > { %v898_v29 = vpop.f32.mrf.mxu3 }
 0x3cd   : > { %v899_v30 = vadd.f32 %v898_v29, %v877_v25  ;;  %v2806_v25 = vsel %vm912_vm1, %v1933_v50, %v911_v14  ;;  %v1753_v50 = vld [vmem:[%s2677_s14 + $0x70] sm:$0xff]  }
 0x3ce   : > { %v1695_v56 = vunpack.c.l.bf16 %v1753_v50 }
 0x3cf   : > { %v2783_v31 = vadd.f32 %v899_v30, %v2730_v49  ;;  %v974_v49 = vld [vmem:[%s2671_s29 + $0x70] sm:$0xff] }
 0x3d0   : > { %v1004_v36 = vunpack.c.l.bf16 %v974_v49  ;;  %v1005_v37 = vunpack.c.h.bf16 %v974_v49 }
 0x3d1   : > { %905 = vadd.xlane.f32.xlu0 %v2783_v31  ;;  %918 = vadd.xlane.f32.xlu2 %v916_v32  ;;  %v917_v33 = vmul.f32 %v2783_v31, %v2783_v31 }
 0x3d2   : > { %1011 = vmatpush.msra.mxu0 %v1004_v36  ;;  %1034 = vmatpush.msrb.mxu1 %v1005_v37 }
 0x3d3   : > { %920 = vadd.xlane.f32.xlu1 %v917_v33 }
 0x3d4   : > { %1012 = vmatpush.msra.mxu0 %v1002_v40  ;;  %1035 = vmatpush.msrb.mxu1 %v1003_v41  ;;  %v1746_v41 = vld [vmem:[%s2677_s14 + $0x38] sm:$0xff]  }
 0x3d6   : > { %1013 = vmatpush.msra.mxu0 %v1000_v43  ;;  %1036 = vmatpush.msrb.mxu1 %v1001_v44  ;;  %v1745_v43 = vld [vmem:[%s2677_s14 + $0x30] sm:$0xff]   ;;  %v1668_v44 = vunpack.c.h.bf16 %v1746_v41 }
 0x3d7   : > { %v1664_v52 = vunpack.c.h.bf16 %v1745_v43 }
 0x3d8   : > { %1014 = vmatpush.msra.mxu0 %v998_v46  ;;  %1037 = vmatpush.msrb.mxu1 %v999_v47  ;;  %v1667_v46 = vunpack.c.l.bf16 %v1746_v41  ;;  %v1699_v47 = vunpack.c.l.bf16 %v1754_v42 }
 0x3d9   : > { %1157 = vmatpush.msrb.mxu2 %v1668_v44  ;;  %v1638_v44 = vld [vmem:[%s2677_s14] sm:$0xff]  }
 0x3da   : > { %1015 = vmatpush.msra.mxu0 %v996_v54  ;;  %1038 = vmatpush.msrb.mxu1 %v997_v55  ;;  %v1696_v54 = vunpack.c.h.bf16 %v1753_v50  ;;  %v1663_v55 = vunpack.c.l.bf16 %v1745_v43  ;;  %v1640_v50 = vunpack.c.h.bf16 %v1638_v44 }
 0x3db   : > { %1158 = vmatpush.msrb.mxu2 %v1667_v46  ;;  %1181 = vmatpush.msra.mxu3 %v1699_v47 }
 0x3dc   : > { %1016 = vmatpush.msra.mxu0 %v994_v58  ;;  %1039 = vmatpush.msrb.mxu1 %v995_v59 }
 0x3dd   : > { %1159 = vmatpush.msrb.mxu2 %v1664_v52  ;;  %1182 = vmatpush.msra.mxu3 %v1696_v54  ;;  %v1672_v52 = vunpack.c.h.bf16 %v1747_v45  ;;  %v1639_v54 = vunpack.c.l.bf16 %v1638_v44 }
 0x3de   : > { %1017 = vmatpush.msra.mxu0 %v992_v61  ;;  %1040 = vmatpush.msrb.mxu1 %v993_v62 }
 0x3df   : > { %1160 = vmatpush.msrb.mxu2 %v1663_v55  ;;  %1183 = vmatpush.msra.mxu3 %v1695_v56  ;;  %v1671_v55 = vunpack.c.l.bf16 %v1747_v45  ;;  %v1008_v56 = vperm.slane %v2739_v53, 2 }
 0x3e0   : > { %1018 = vmatpush.msra.mxu0 %v990_v1  ;;  %1041 = vmatpush.msrb.mxu1 %v991_v2 }
 0x3e2   : > { %1019 = vmatpush.msra.mxu0 %v988_v4  ;;  %1042 = vmatpush.msrb.mxu1 %v989_v5  ;;  %v954_v5 = vperm.slane %v2739_v53, 4 }
 0x3e4   : > { %1020 = vmatpush.msra.mxu0 %v986_v8  ;;  %1043 = vmatpush.msrb.mxu1 %v987_v9  ;;  %v957_v9 = vperm.slane %v2739_v53, 5 }
 0x3e6   : > { %1021 = vmatpush.msra.mxu0 %v984_v11  ;;  %1044 = vmatpush.msrb.mxu1 %v985_v12 }
 0x3e8   : > { %1022 = vmatpush.msra.mxu0 %v982_v15  ;;  %1045 = vmatpush.msrb.mxu1 %v983_v16  ;;  %v1744_v16 = vld [vmem:[%s2677_s14 + $0x28] sm:$0xff]  }
 0x3ea   : > { %1023 = vmatpush.msra.mxu0 %v980_v19  ;;  %1046 = vmatpush.msrb.mxu1 %v981_v20  ;;  %v1659_v19 = vunpack.c.l.bf16 %v1744_v16  ;;  %v1691_v20 = vunpack.c.l.bf16 %v1752_v17 }
 0x3ec   : > { %1024 = vmatpush.msra.mxu0 %v978_v23  ;;  %1047 = vmatpush.msrb.mxu1 %v979_v24  ;;  %v1656_v23 = vunpack.c.h.bf16 %v1743_v21  ;;  %v1688_v24 = vunpack.c.h.bf16 %v1751_v22 }
 0x3ee   : > { %1025 = vmatpush.msra.mxu0 %v976_v26  ;;  %1048 = vmatpush.msrb.mxu1 %v977_v27  ;;  %v1655_v26 = vunpack.c.l.bf16 %v1743_v21  ;;  %v1687_v27 = vunpack.c.l.bf16 %v1751_v22 }
 0x43c   : > { %v904_v18 = vpop.xlane.xlu2 %903 }
 0x43d   : > { %v914_v29 = vmul.f32 %v2806_v25, %v904_v18  ;;  %v1692_v18 = vunpack.c.h.bf16 %v1752_v17 }
 0x43f   : > { %v924_v33 = vmul.f32 %v914_v29, %v914_v29  ;;  %v928_v4 = vsub.f32 %v2779_v28, %v914_v29  ;;  %1184 = vmatpush.msra.mxu3 %v1692_v18  ;;  %v1742_v29 = vld [vmem:[%s2677_s14 + $0x18] sm:$0xff]  }
 0x441   : > { %1185 = vmatpush.msra.mxu3 %v1691_v20 }
 0x443   : > { %1186 = vmatpush.msra.mxu3 %v1688_v24 }
 0x444   : > { %v906_v30 = vpop.xlane.xlu0 %905  ;;  %v919_v32 = vpop.xlane.xlu2 %918 }
 0x445   : > { %v915_v48 = vmul.f32 %v2806_v25, %v906_v30  ;;  %v922_v34 = vmul.f32 %v919_v32, %v2806_v25  ;;  %v1750_v30 = vld [vmem:[%s2677_s14 + $0x58] sm:$0xff]   ;;  %1187 = vmatpush.msra.mxu3 %v1687_v27  ;;  %v1652_v32 = vunpack.c.h.bf16 %v1742_v29 }
 0x446   : > { %v921_v35 = vpop.xlane.xlu1 %920 }
 0x447   : > { %v925_v49 = vmul.f32 %v915_v48, %v915_v48  ;;  %v926_v36 = vsub.f32 %v922_v34, %v924_v33  ;;  %v923_v37 = vmul.f32 %v921_v35, %v2806_v25  ;;  %v929_v11 = vsub.f32 %v2783_v31, %v915_v48  ;;  %v1741_v35 = vld [vmem:[%s2677_s14 + $0x10] sm:$0xff]  }
 0x448   : > { %v1660_v31 = vunpack.c.h.bf16 %v1744_v16  ;;  %v1684_v33 = vunpack.c.h.bf16 %v1750_v30  ;;  %v1651_v48 = vunpack.c.l.bf16 %v1742_v29  ;;  %v1683_v34 = vunpack.c.l.bf16 %v1750_v30 }
 0x449   : > { %v930_v38 = vadd.f32 1e-12, %v926_v36  ;;  %v927_v39 = vsub.f32 %v923_v37, %v925_v49  ;;  %v1749_v49 = vld [vmem:[%s2677_s14 + $0x50] sm:$0xff]   ;;  %v1648_v36 = vunpack.c.h.bf16 %v1741_v35 }
 0x44a   : > { %1161 = vmatpush.msrb.mxu2 %v1660_v31  ;;  %1188 = vmatpush.msra.mxu3 %v1684_v33  ;;  %v1680_v37 = vunpack.c.h.bf16 %v1749_v49  ;;  %v1679_v41 = vunpack.c.l.bf16 %v1749_v49 }
 0x44b   : > { %1934 = vrsqrt.f32 %v930_v38  ;;  %v931_v40 = vadd.f32 1e-12, %v927_v39  ;;  %vm938_vm3 = vweird.f32 %v930_v38  ;;  %v1748_v39 = vld [vmem:[%s2677_s14 + $0x48] sm:$0xff]  }
 0x44c   : > { %1162 = vmatpush.msrb.mxu2 %v1659_v19  ;;  %1189 = vmatpush.msra.mxu3 %v1683_v34  ;;  %v1676_v43 = vunpack.c.h.bf16 %v1748_v39  ;;  %v1675_v47 = vunpack.c.l.bf16 %v1748_v39 }
 0x44d   : > { %1936 = vrsqrt.f32 %v931_v40  ;;  %vm948_vm6 = vweird.f32 %v931_v40 }
 0x44e   : > { %1163 = vmatpush.msrb.mxu2 %v1656_v23  ;;  %1190 = vmatpush.msra.mxu3 %v1680_v37 }
 0x450   : > { %1164 = vmatpush.msrb.mxu2 %v1655_v26  ;;  %1191 = vmatpush.msra.mxu3 %v1679_v41 }
 0x451   : > { %v1935_v57 = vpop.eup %1934 }
 0x452   : > { %v933_v58 = vmul.f32 %v1935_v57, %v930_v38  ;;  %vm939_vm2 = vweird.f32 %v1935_v57  ;;  %1165 = vmatpush.msrb.mxu2 %v1652_v32  ;;  %v1740_v38 = vld [vmem:[%s2677_s14 + $0x8] sm:$0xff]   ;;  %1192 = vmatpush.msra.mxu3 %v1676_v43 }
 0x453   : > { %v1937_v59 = vpop.eup %1936  ;;  %vm940_vm5 = vmor %vm938_vm3, %vm939_vm2  ;;  %v1644_v42 = vunpack.c.h.bf16 %v1740_v38  ;;  %v1643_v46 = vunpack.c.l.bf16 %v1740_v38  ;;  %v1156_v38 = vperm.slane %v2739_v53, 3 }
 0x454   : > { %v934_v60 = vmul.f32 %v1935_v57, %v933_v58  ;;  %v943_v61 = vmul.f32 %v1937_v59, %v931_v40  ;;  %vm949_vm4 = vweird.f32 %v1937_v59  ;;  %1166 = vmatpush.msrb.mxu2 %v1651_v48  ;;  %v1647_v40 = vunpack.c.l.bf16 %v1741_v35  ;;  %1193 = vmatpush.msra.mxu3 %v1675_v47 }
 0x455   : > { %vm950_vm7 = vmor %vm948_vm6, %vm949_vm4 }
 0x456   : > { %v935_v62 = vmul.f32 0.5, %v934_v60  ;;  %v944_v63 = vmul.f32 %v1937_v59, %v943_v61  ;;  %1167 = vmatpush.msrb.mxu2 %v1648_v36  ;;  %1194 = vmatpush.msra.mxu3 %v1672_v52 }
 0x458   : > { %v936_v0 = vsub.f32 1.5, %v935_v62  ;;  %v945_v1 = vmul.f32 0.5, %v944_v63  ;;  %1168 = vmatpush.msrb.mxu2 %v1647_v40  ;;  %1195 = vmatpush.msra.mxu3 %v1671_v55 }
 0x45a   : > { %v937_v2 = vmul.f32 %v1935_v57, %v936_v0  ;;  %v946_v3 = vsub.f32 1.5, %v945_v1  ;;  %1169 = vmatpush.msrb.mxu2 %v1644_v42 }
 0x45c   : > { %v941_v6 = vsel %vm940_vm5, %v1935_v57, %v937_v2  ;;  %v947_v7 = vmul.f32 %v1937_v59, %v946_v3  ;;  %1170 = vmatpush.msrb.mxu2 %v1643_v46  ;;  %v1009_v57 = vperm.slane %v2735_v51, 2 }
 0x45d   : > { %v952_v8 = vmul.f32 %v941_v6, %v928_v4 }
 0x45e   : > { %v951_v10 = vsel %vm950_vm7, %v1937_v59, %v947_v7  ;;  %1171 = vmatpush.msrb.mxu2 %v1640_v50 }
 0x45f   : > { %v955_v12 = vmul.f32 %v954_v5, %v952_v8  ;;  %v953_v28 = vmul.f32 %v951_v10, %v929_v11 }
 0x460   : > { %1172 = vmatpush.msrb.mxu2 %v1639_v54 }
 0x461   : > { %v2820_v13 = vadd.f32 %v957_v9, %v955_v12  ;;  %v956_v14 = vmul.f32 %v954_v5, %v953_v28 }
 0x463   : > { %1026 = vmatmul.f32.vlgmr.msra.gmra.mxu0 %v2820_v13  ;;  %1049 = vmatmul.f32.vlgmr.msrb.gmra.mxu1 %v2820_v13  ;;  %v2824_v15 = vadd.f32 %v957_v9, %v956_v14 }
 0x46b   : > { %1029 = vmatmul.f32.gmra.mxu0 %v2824_v15  ;;  %1052 = vmatmul.f32.gmra.mxu1 %v2824_v15 }
 0x4e0   : > { %v1027_v58 = vpop.f32.mrf.mxu0  ;;  %v1050_v59 = vpop.f32.mrf.mxu1 }
 0x4e1   : > { %v1028_v60 = vadd.f32 %v1027_v58, %v1008_v56  ;;  %v1051_v61 = vadd.f32 %v1050_v59, %v1009_v57 }
 0x4e3   : > { %v1060_v62 = vmul.f32 0.044715, %v1028_v60  ;;  %v1061_v63 = vmul.f32 0.044715, %v1051_v61  ;;  %v1056_v21 = vmul.f32 0.5, %v1028_v60  ;;  %v1057_v26 = vmul.f32 0.5, %v1051_v61 }
 0x4e5   : > { %v1065_v0 = vmul.f32 %v1061_v63, %v1051_v61  ;;  %v1064_v1 = vmul.f32 %v1060_v62, %v1028_v60 }
 0x4e7   : > { %v1069_v2 = vmul.f32 %v1065_v0, %v1051_v61  ;;  %v1068_v3 = vmul.f32 %v1064_v1, %v1028_v60 }
 0x4e8   : > { %v1030_v4 = vpop.f32.mrf.mxu0  ;;  %v1053_v5 = vpop.f32.mrf.mxu1 }
 0x4e9   : > { %v1031_v6 = vadd.f32 %v1030_v4, %v1008_v56  ;;  %v1054_v7 = vadd.f32 %v1053_v5, %v1009_v57  ;;  %v1072_v8 = vadd.f32 %v1068_v3, %v1028_v60  ;;  %v1073_v9 = vadd.f32 %v1069_v2, %v1051_v61 }
 0x4eb   : > { %v1076_v10 = vmul.f32 0.7978846, %v1072_v8  ;;  %v1077_v11 = vmul.f32 0.7978846, %v1073_v9  ;;  %v1062_v12 = vmul.f32 0.044715, %v1031_v6 }
 0x4ec   : > { %v1063_v51 = vmul.f32 0.044715, %v1054_v7  ;;  %v1058_v48 = vmul.f32 0.5, %v1031_v6  ;;  %v1059_v35 = vmul.f32 0.5, %v1054_v7 }
 0x4ed   : > { %1938 = vtanh.f32 %v1076_v10  ;;  %v1066_v28 = vmul.f32 %v1062_v12, %v1031_v6 }
 0x4ee   : > { %1940 = vtanh.f32 %v1077_v11  ;;  %v1067_v14 = vmul.f32 %v1063_v51, %v1054_v7  ;;  %v1249_v11 = vperm.slane %v2739_v53, 6 }
 0x4ef   : > { %v1070_v16 = vmul.f32 %v1066_v28, %v1031_v6 }
 0x4f0   : > { %v1071_v17 = vmul.f32 %v1067_v14, %v1054_v7 }
 0x4f1   : > { %v1074_v31 = vadd.f32 %v1070_v16, %v1031_v6 }
 0x4f2   : > { %v1075_v18 = vadd.f32 %v1071_v17, %v1054_v7 }
 0x4f3   : > { %v1939_v19 = vpop.eup %1938  ;;  %v1078_v23 = vmul.f32 0.7978846, %v1074_v31 }
 0x4f4   : > { %v1941_v20 = vpop.eup %1940  ;;  %v1084_v22 = vadd.f32 1.0, %v1939_v19  ;;  %v1079_v24 = vmul.f32 0.7978846, %v1075_v18 }
 0x4f5   : > { %v1085_v27 = vadd.f32 1.0, %v1941_v20  ;;  %1942 = vtanh.f32 %v1078_v23 }
 0x4f6   : > { %v1088_v29 = vmul.f32 %v1084_v22, %v1056_v21  ;;  %1944 = vtanh.f32 %v1079_v24 }
 0x4f7   : > { %v1089_v30 = vmul.f32 %v1085_v27, %v1057_v26 }
 0x4f8   : > { %1173 = vmatmul.f32.vlgmr.msrb.gmra.mxu2 %v1088_v29 }
 0x4f9   : > { %1196 = vmatmul.f32.vlgmr.msra.gmra.mxu3 %v1089_v30 }
 0x4fb   : > { %v1943_v32 = vpop.eup %1942 }
 0x4fc   : > { %v1945_v33 = vpop.eup %1944  ;;  %v1086_v34 = vadd.f32 1.0, %v1943_v32 }
 0x4fd   : > { %v1087_v49 = vadd.f32 1.0, %v1945_v33 }
 0x4fe   : > { %v1090_v36 = vmul.f32 %v1086_v34, %v1058_v48 }
 0x4ff   : > { %v1091_v37 = vmul.f32 %v1087_v49, %v1059_v35 }
 0x500   : > { %1176 = vmatmul.f32.gmra.mxu2 %v1090_v36 }
 0x501   : > { %1199 = vmatmul.f32.gmra.mxu3 %v1091_v37 }
 0x57b   : > { %v1174_v39 = vpop.f32.mrf.mxu2 }
 0x57c   : > { %v1175_v40 = vadd.f32 %v1174_v39, %v1156_v38  ;;  %v1197_v41 = vpop.f32.mrf.mxu3 }
 0x57e   : > { %v1198_v42 = vadd.f32 %v1197_v41, %v1175_v40 }
 0x580   : > { %v1203_v43 = vadd.f32 %v1198_v42, %v2820_v13 }
 0x582   : > { %1205 = vadd.xlane.f32.xlu2 %v1203_v43  ;;  %v1211_v44 = vmul.f32 %v1203_v43, %v1203_v43 }
 0x583   : > { %v1177_v45 = vpop.f32.mrf.mxu2 }
 0x584   : > { %1213 = vadd.xlane.f32.xlu1 %v1211_v44  ;;  %v1178_v46 = vadd.f32 %v1177_v45, %v1156_v38  ;;  %v1200_v47 = vpop.f32.mrf.mxu3 }
 0x586   : > { %v1201_v50 = vadd.f32 %v1200_v47, %v1178_v46 }
 0x588   : > { %v1204_v52 = vadd.f32 %v1201_v50, %v2824_v15 }
 0x58a   : > { %1207 = vadd.xlane.f32.xlu0 %v1204_v52  ;;  %v1212_v54 = vmul.f32 %v1204_v52, %v1204_v52 }
 0x58c   : > { %1215 = vadd.xlane.f32.xlu2 %v1212_v54 }
 0x5f5   : > { %v1206_v55 = vpop.xlane.xlu2 %1205 }
 0x5f6   : > { %v1209_v56 = vmul.f32 %v1206_v55, %v2806_v25 }
 0x5f7   : > { %v1214_v57 = vpop.xlane.xlu1 %1213 }
 0x5f8   : > { %v1219_v58 = vmul.f32 %v1209_v56, %v1209_v56  ;;  %v1217_v59 = vmul.f32 %v1214_v57, %v2806_v25  ;;  %v1223_v10 = vsub.f32 %v1203_v43, %v1209_v56 }
 0x5fa   : > { %v1221_v13 = vsub.f32 %v1217_v59, %v1219_v58 }
 0x5fc   : > { %v1225_v60 = vadd.f32 1e-12, %v1221_v13 }
 0x5fd   : > { %v1208_v61 = vpop.xlane.xlu0 %1207 }
 0x5fe   : > { %1946 = vrsqrt.f32 %v1225_v60  ;;  %v1210_v62 = vmul.f32 %v1208_v61, %v2806_v25  ;;  %vm1233_vm9 = vweird.f32 %v1225_v60 }
 0x5ff   : > { %v1216_v63 = vpop.xlane.xlu2 %1215 }
 0x600   : > { %v1220_v0 = vmul.f32 %v1210_v62, %v1210_v62  ;;  %v1218_v15 = vmul.f32 %v1216_v63, %v2806_v25  ;;  %v1252_v25 = vperm.slane %v2739_v53, 7  ;;  %v1224_v20 = vsub.f32 %v1204_v52, %v1210_v62 }
 0x602   : > { %v1222_v1 = vsub.f32 %v1218_v15, %v1220_v0 }
 0x604   : > { %v1947_v2 = vpop.eup %1946  ;;  %v1226_v4 = vadd.f32 1e-12, %v1222_v1 }
 0x605   : > { %v1228_v3 = vmul.f32 %v1947_v2, %v1225_v60  ;;  %vm1234_vm8 = vweird.f32 %v1947_v2 }
 0x606   : > { %1948 = vrsqrt.f32 %v1226_v4  ;;  %vm1235_vm10 = vmor %vm1233_vm9, %vm1234_vm8  ;;  %vm1243_vm12 = vweird.f32 %v1226_v4 }
 0x607   : > { %v1229_v5 = vmul.f32 %v1947_v2, %v1228_v3 }
 0x609   : > { %v1230_v6 = vmul.f32 0.5, %v1229_v5 }
 0x60b   : > { %v1231_v7 = vsub.f32 1.5, %v1230_v6 }
 0x60c   : > { %v1949_v8 = vpop.eup %1948 }
 0x60d   : > { %v1232_v9 = vmul.f32 %v1947_v2, %v1231_v7  ;;  %v1238_v12 = vmul.f32 %v1949_v8, %v1226_v4  ;;  %vm1244_vm11 = vweird.f32 %v1949_v8 }
 0x60e   : > { %vm1245_vm13 = vmor %vm1243_vm12, %vm1244_vm11 }
 0x60f   : > { %v1236_v51 = vsel %vm1235_vm10, %v1947_v2, %v1232_v9  ;;  %v1239_v14 = vmul.f32 %v1949_v8, %v1238_v12 }
 0x610   : > { %v1247_v28 = vmul.f32 %v1236_v51, %v1223_v10 }
 0x611   : > { %v1240_v17 = vmul.f32 0.5, %v1239_v14 }
 0x612   : > { %v1250_v16 = vmul.f32 %v1249_v11, %v1247_v28 }
 0x613   : > { %v1241_v18 = vsub.f32 1.5, %v1240_v17 }
 0x614   : > { %v1253_v31 = vadd.f32 %v1252_v25, %v1250_v16 }
 0x615   : > { %v1242_v19 = vmul.f32 %v1949_v8, %v1241_v18 }
 0x616   : > { %1255 = vst [vmem:[#allocation2] sm:$0xff] %v1253_v31 }
 0x617   : > { %v1246_v21 = vsel %vm1245_vm13, %v1949_v8, %v1242_v19 }
 0x618   : > { %v1248_v22 = vmul.f32 %v1246_v21, %v1224_v20 }
 0x61a   : > { %v1251_v23 = vmul.f32 %v1249_v11, %v1248_v22  ;;  %1260 = sbr.rel (%p1598_p13) target bundleno = 1730 (0x6c2), region = 92 }
 0x61c   : > { %v1254_v24 = vadd.f32 %v1252_v25, %v1251_v23 }
 0x61e   : > { %1256 = vst [vmem:[#allocation2 + $0x8] sm:$0xff] %v1254_v24 }
 0x61f   : > { %1261 = vst [vmem:[%s579_s30] sm:$0x1] %v1253_v31  ;;  %v1761_v53 = vld [vmem:[#allocation15 + $0x38] sm:$0xff]   ;;  %v1760_v26 = vld [vmem:[#allocation15 + $0x30] sm:$0xff]   ;;  %v1759_v32 = vld [vmem:[#allocation15 + $0x28] sm:$0xff]  }
 0x620   : > { %v1732_v27 = vunpack.c.h.bf16 %v1761_v53  ;;  %v1731_v29 = vunpack.c.l.bf16 %v1761_v53  ;;  %v1728_v30 = vunpack.c.h.bf16 %v1760_v26  ;;  %v1727_v33 = vunpack.c.l.bf16 %v1760_v26  ;;  %v1758_v34 = vld [vmem:[#allocation15 + $0x20] sm:$0xff]   ;;  %v1757_v36 = vld [vmem:[#allocation15 + $0x18] sm:$0xff]   ;;  %v1756_v39 = vld [vmem:[#allocation15 + $0x10] sm:$0xff]  }
 0x621   : > { %v1724_v48 = vunpack.c.h.bf16 %v1759_v32  ;;  %v1723_v35 = vunpack.c.l.bf16 %v1759_v32  ;;  %v1720_v49 = vunpack.c.h.bf16 %v1758_v34  ;;  %v1719_v37 = vunpack.c.l.bf16 %v1758_v34  ;;  %v1755_v42 = vld [vmem:[#allocation15 + $0x8] sm:$0xff]   ;;  %v1702_v45 = vld [vmem:[#allocation15] sm:$0xff]   ;;  %v1294_v52 = vld [vmem:[%s3010_s9] sm:$0x1] }
 0x622   : > { %1295 = vmatpush.msra.mxu0 %v1732_v27  ;;  %v1716_v38 = vunpack.c.h.bf16 %v1757_v36  ;;  %v1715_v40 = vunpack.c.l.bf16 %v1757_v36  ;;  %v1712_v41 = vunpack.c.h.bf16 %v1756_v39  ;;  %v1711_v43 = vunpack.c.l.bf16 %v1756_v39 }
 0x623   : > { %v1708_v44 = vunpack.c.h.bf16 %v1755_v42  ;;  %v1707_v46 = vunpack.c.l.bf16 %v1755_v42  ;;  %v1704_v47 = vunpack.c.h.bf16 %v1702_v45  ;;  %v1703_v50 = vunpack.c.l.bf16 %v1702_v45 }
 0x624   : > { %1296 = vmatpush.msra.mxu0 %v1731_v29 }
 0x626   : > { %1297 = vmatpush.msra.mxu0 %v1728_v30 }
 0x628   : > { %1298 = vmatpush.msra.mxu0 %v1727_v33 }
 0x62a   : > { %1299 = vmatpush.msra.mxu0 %v1724_v48 }
 0x62c   : > { %1300 = vmatpush.msra.mxu0 %v1723_v35 }
 0x62e   : > { %1301 = vmatpush.msra.mxu0 %v1720_v49 }
 0x630   : > { %1302 = vmatpush.msra.mxu0 %v1719_v37 }
 0x632   : > { %1303 = vmatpush.msra.mxu0 %v1716_v38 }
 0x634   : > { %1304 = vmatpush.msra.mxu0 %v1715_v40 }
 0x636   : > { %1305 = vmatpush.msra.mxu0 %v1712_v41 }
 0x638   : > { %1306 = vmatpush.msra.mxu0 %v1711_v43 }
 0x63a   : > { %1307 = vmatpush.msra.mxu0 %v1708_v44 }
 0x63c   : > { %1308 = vmatpush.msra.mxu0 %v1707_v46 }
 0x63e   : > { %1309 = vmatpush.msra.mxu0 %v1704_v47 }
 0x640   : > { %1310 = vmatpush.msra.mxu0 %v1703_v50 }
 0x641   : > { %1311 = vmatmul.f32.vlgmr.msra.gmra.mxu0 %v1253_v31 }
 0x6be   : > { %v1312_v54 = vpop.f32.mrf.mxu0 }
 0x6bf   : > { %v1313_v55 = vadd.f32 %v1312_v54, %v1294_v52 }
 0x6c1   : > { %1315 = vst [vmem:[%s585_s27] sm:$0x1] %v1313_v55 }
 0x6c2 PF: > { %s3011_s29 = sld [smem:[#allocation34_spill]]  ;;  %s1331_s20 = sshll.u32 %s579_s30, 4  ;;  %s1332_s20 = int_to_ptr.vmem [resolvable:$true] %s1331_s20 }
 0x6c3   : > { %s3012_s5 = sld [smem:[#allocation50_spill]]  ;;  %s1317_s1 = scalar_lea.sflag [#allocation6], %s2653_s18 }
 0x6c9   : > { %s1329_s7 = scalar_lea.hbm %s3012_s5, %s3011_s29  ;;  %s2208_s24 = scalar_lea.hbm %s3012_s5, 2 }
 0x6ca   : > { %s1333_s25 = sshll.u32 %s1329_s7, 4  ;;  %s1334_s25 = int_to_ptr.hbm [resolvable:$true] %s1333_s25 }
 0x6cb   : > { %s2202_s10 = sshra.s32 %s1334_s25, 4  ;;  %s2203_s10 = int_to_ptr.hbm [resolvable:$true] %s2202_s10 }
 0x6cc   : > { %s2204_s8 = scalar_lea.hbm %s2203_s10, 1  ;;  %p2209_p12 = scmp.lt.s32.totalorder %s2203_s10, %s3012_s5 }
 0x6cd   : > { %p2205_p0 = scmp.ne.s32.totalorder %s2203_s10, %s2204_s8  ;;  %p2210_p4 = scmp.lt.s32.totalorder %s2208_s24, %s2204_s8 }
 0x6cf   : > { %p2206_p5 = pnand %p2205_p0, %p2598_p1  ;;  %p2211_p2 = por %p2210_p4, %p2209_p12 }
 0x6d1   : > { %p2207_p10 = pneg %p2206_p5 }
 0x6d3   : > { %p2212_p3 = pnand %p2211_p2, %p2207_p10 }
 0x6d5   : > { %2215 = shalt.err (!%p2212_p3)
}
 0x6d6   : > { %1787 = dma.vmem_to_hbm [thread:$0]  (%p2598_p1), %s1332_s20, 16, %s1334_s25, %s1317_s1  }
 0x6d7   : > { %s3013_s26 = sld [smem:[#allocation51_spill]]  ;;  %s1344_s9 = sshll.u32 %s585_s27, 4  ;;  %s1345_s9 = int_to_ptr.vmem [resolvable:$true] %s1344_s9 }
 0x6d8   : > { %s1321_s19 = scalar_lea.sflag [#allocation18], %s2653_s18 }
 0x6dd   : > { %s1342_s13 = scalar_lea.hbm %s3013_s26, %s3011_s29  ;;  %s2236_s20 = scalar_lea.hbm %s3013_s26, 2 }
 0x6de   : > { %s1346_s14 = sshll.u32 %s1342_s13, 4  ;;  %s1347_s14 = int_to_ptr.hbm [resolvable:$true] %s1346_s14 }
 0x6df   : > { %s2230_s7 = sshra.s32 %s1347_s14, 4  ;;  %s2231_s7 = int_to_ptr.hbm [resolvable:$true] %s2230_s7 }
 0x6e0   : > { %s2232_s10 = scalar_lea.hbm %s2231_s7, 1  ;;  %p2237_p11 = scmp.lt.s32.totalorder %s2231_s7, %s3013_s26 }
 0x6e1   : > { %p2233_p7 = scmp.ne.s32.totalorder %s2231_s7, %s2232_s10  ;;  %p2238_p13 = scmp.lt.s32.totalorder %s2236_s20, %s2232_s10 }
 0x6e3   : > { %p2234_p9 = pnand %p2233_p7, %p2598_p1  ;;  %p2239_p0 = por %p2238_p13, %p2237_p11 }
 0x6e5   : > { %p2235_p8 = pneg %p2234_p9 }
 0x6e7   : > { %p2240_p5 = pnand %p2239_p0, %p2235_p8 }
 0x6e9   : > { %2243 = shalt.err (!%p2240_p5)
}
 0x6ea   : > { %1788 = dma.vmem_to_hbm [thread:$0]  (%p2598_p1), %s1345_s9, 16, %s1347_s14, %s1321_s19  }
 0x6eb PF: > { %p1825_p10 = scmp.ge.s32.totalorder %s2362_s23, 2  ;;  %s1358_s18 = sand.u32 1, %s2334_s16  }
 0x6ec   : > { %s1359_s27 = scalar_lea.sflag [#allocation6], %s1358_s18 }
 0x6ed   : > { %p1815_p12 = pnand %p1825_p10, %p2609_p6 }
 0x6ef   : > { %p1816_p4 = pneg %p1815_p12 }
 0x6f1   : > { %2313 = dma.done.wait (%p1816_p4), %s1359_s27, 16  }
 0x6f2   : > { %2315 = vsyncadd (%p1816_p4), %s1359_s27, 4294967280  ;;  %s1368_s29 = scalar_lea.sflag [#allocation18], %s1358_s18 }
 0x6f3   : > { %2317 = dma.done.wait (%p1816_p4), %s1368_s29, 16  }
 0x6f4   : > { %2319 = vsyncadd (%p1816_p4), %s1368_s29, 4294967280  ;;  %s39_s23 = sadd.s32 1, %s2362_s23   ;;  %s3014_s13 = sld [smem:[#allocation31_spill]] }
 0x6f5   : > { %p36_p2 = scmp.ge.s32.totalorder %s39_s23, 6   ;;  %s3015_s12 = sld [smem:[#allocation40_spill]] }
 0x6f6   : > { %s3016_s11 = sld [smem:[#allocation32_spill]]  ;;  %s3021_s14 = smov %s2330_s15 }
 0x6f7   : > { %s3017_s18 = sld [smem:[#allocation41_spill]]  ;;  %s3023_s16 = smov %s2338_s17 }
 0x6f8   : > { %s3018_s20 = sld [smem:[#allocation35_spill]]  ;;  %s3025_s19 = smov %s2354_s21 }
 0x6f9   : > { %s3019_s0 = sld [smem:[#allocation38_spill]] }
 0x6fa   : > { %s3020_s22 = sld [smem:[#allocation39_spill]] }
 0x6fb   : > { %s3022_s15 = smov %s3015_s12  ;;  %38 = sbr.rel (!%p36_p2) target bundleno = 28 (0x1c), region = 192 }
 0x6fc   : > { %s3024_s17 = smov %s3016_s11 }
 0x6ff   : > { %s3026_s21 = smov %s3019_s0 }
 0x700   :  { %1373 = vsyncpa [#allocation5], 1 }
 0x701   :  { %1375 = vsyncpa [#allocation5 + $0x1], 1 }
 0x702   :  { %1376 = vsyncpa [#allocation8], 1 }
 0x703   :  { %1378 = vsyncpa [#allocation8 + $0x1], 1 }
 0x704   :  { %1379 = vsyncpa [#allocation11], 1 }
 0x705   :  { %1381 = vsyncpa [#allocation11 + $0x1], 1 }
 0x706   :  { %1382 = vsyncpa [#allocation14], 1 }
 0x707   :  { %1384 = vsyncpa [#allocation14 + $0x1], 1 }
 0x708   :  { %1385 = vsyncpa [#allocation6], 1 }
 0x709   :  { %1387 = vsyncpa [#allocation6 + $0x1], 1 }
 0x70a   :  { %1388 = vsyncpa [#allocation18], 1 }
 0x70b   :  { %1390 = vsyncpa [#allocation18 + $0x1], 1 }
 0x70c   :  { %1391 = vsyncmov [#allocation3] }
 0x70f   :  { %s1392_s24 = vpop.sfrf %1391 }
 0x710   :  { %p1601_p1 = scmp.ne.s32.totalorder %s1392_s24, 0 }
 0x712   :  { %1396 = shalt.err (%p1601_p1)  }

</bundles_post_ra>
